<compile_context>
chip_gen: v6e
topology: v6e:2x2x1
jax: 0.10.0
libtpu: 0.0.40
codegen_flags: <defaults>
</compile_context>

<pallas_src>
import functools
import math

import jax
import jax.numpy as jnp
from jax import lax
from jax.experimental import pallas as pl
from jax.experimental.pallas import tpu as pltpu


def _round_up(x, m):
    return (x + m - 1) // m * m


def _vmem_capacity_bytes():
    try:
        return int(pltpu.get_tpu_info().vmem_capacity_bytes)
    except Exception:
        return 128 * 1024 * 1024


def _vmem_estimate(tm, H, TKb, k, itemsize):
    """Rough per-step VMEM footprint: double-buffered blocks + masked scratch
    + the f32 `pre` temporary (with ~50% headroom for misc temporaries)."""
    lane_k = max(k, 128)
    dbuf = 2 * (tm * H * itemsize          # x block
                + H * TKb * itemsize       # W block
                + TKb * 4                  # bias block (f32)
                + TKb * H * itemsize       # values block
                + tm * H * 4               # out block (f32, resident)
                + 2 * tm * lane_k * 4)     # acts + idx blocks
    scratch = tm * TKb * itemsize          # masked-activation operand
    temps = (tm * TKb * 4) * 3 // 2        # f32 `pre` + working headroom
    return dbuf + scratch + temps


def _choose_tiles(N8, H, k, G, itemsize, budget_bytes, tm_pref):
    """Pick (tm, key_block_groups).  kg must divide k and — unless it covers
    all groups — span a multiple of 128 lanes (BlockSpec last-dim rule)."""
    valid = [kg for kg in range(1, k + 1)
             if k % kg == 0 and (kg == k or (kg * G) % 128 == 0)]
    tm = max(8, min(_round_up(tm_pref, 8), N8))
    while True:
        fits = [kg for kg in valid
                if _vmem_estimate(tm, H, kg * G, k, itemsize) <= budget_bytes]
        if fits:
            return tm, max(fits)
        if tm <= 128:
            return tm, min(valid)          # last resort (tiny-but-fat shapes)
        tm = max(128, _round_up(tm // 2, 8))


def _sparse_mlp_kernel(x_ref, w_ref, b_ref, v_ref,
                       out_ref, acts_ref, idx_ref, masked_ref,
                       *, kg, G, kb):
    j = pl.program_id(1)                   # key-block index (reduction axis)
    Tm = x_ref.shape[0]
    k = kb * kg

    @pl.when(j == 0)
    def _():
        out_ref[...] = jnp.zeros_like(out_ref)
        if kb > 1:
            acts_ref[...] = jnp.zeros_like(acts_ref)
            idx_ref[...] = jnp.zeros_like(idx_ref)

    # Dense projection + bias + ReLU.  MXU matmul with f32 accumulation;
    # bias/relu/max/argmax all stay in f32.
    pre = jnp.dot(x_ref[...], w_ref[...], preferred_element_type=jnp.float32)
    pre = jnp.maximum(pre + b_ref[...], 0.0)                 # [Tm, kg*G] f32

    iota = lax.broadcasted_iota(jnp.int32, (Tm, G), 1)       # hoisted
    acts_cols = []
    idx_cols = []
    for g in range(kg):                                      # static unroll
        sl = pre[:, g * G:(g + 1) * G]                       # [Tm, G]
        m = jnp.max(sl, axis=-1, keepdims=True)              # [Tm, 1]
        is_max = sl == m
        # first index achieving the max (torch.max tie-breaking rule)
        first_idx = jnp.min(jnp.where(is_max, iota, G), axis=-1, keepdims=True)
        first = iota == first_idx
        # masked-activation operand written straight into the VMEM scratch
        # (no concatenate, no extra f32 copy).
        masked_ref[:, g * G:(g + 1) * G] = jnp.where(first, sl, 0.0).astype(
            masked_ref.dtype)
        acts_cols.append(m)
        idx_cols.append(first_idx + (j * kg + g) * G)        # global key index

    # One fused "embedding bag" matmul over the whole key block, accumulated
    # directly into the VMEM-resident f32 output block.
    out_ref[...] += jnp.dot(masked_ref[...], v_ref[...],
                            preferred_element_type=jnp.float32)

    # Place this step's kg columns into the lane-dense (Tm, k) output blocks.
    # They are VMEM-resident across the key axis and flushed to HBM once per
    # token block (no per-step masked partial HBM stores).
    cols = lax.broadcasted_iota(jnp.int32, (Tm, k), 1)
    if kb == 1:
        new_acts = jnp.zeros((Tm, k), jnp.float32)
        new_idx = jnp.zeros((Tm, k), jnp.int32)
    else:
        new_acts = acts_ref[...]
        new_idx = idx_ref[...]
    for g in range(kg):
        hit = cols == (j * kg + g)
        new_acts = jnp.where(hit, acts_cols[g], new_acts)
        new_idx = jnp.where(hit, idx_cols[g], new_idx)
    acts_ref[...] = new_acts
    idx_ref[...] = new_idx


def sparse_mlp_forward(hidden_states, W, b, values, k, *,
                       tm=None, key_block_groups=None,
                       compute_dtype=jnp.bfloat16):
    """hidden_states: [B, T, H].  W: [H, total_keys] (transposed torch Linear
    weight), b: [total_keys], values: [total_keys, H].  Returns a dict like
    the torch module (hidden_states f32, top_acts f32, top_indices i32)."""
    B, T, H = hidden_states.shape
    total_keys = W.shape[1]
    assert total_keys % k == 0
    G = total_keys // k
    N = B * T
    N8 = _round_up(N, 8)

    itemsize = jnp.dtype(compute_dtype).itemsize
    vmem_cap = _vmem_capacity_bytes()
    budget = int(vmem_cap * 0.72)                 # tile-sizing budget
    vmem_limit = max(32 * 1024 * 1024,
                     min(int(vmem_cap * 0.85), 112 * 1024 * 1024))

    if tm is None:
        # W / values are re-streamed from HBM once per token block, so
        # arithmetic intensity ~ tm flops/byte: pick tm past the HBM knee.
        tm = 512 if vmem_cap <= 96 * 1024 * 1024 else 768
    tm_pref = max(8, min(_round_up(tm, 8), N8))
    if N8 <= tm_pref and N8 >= 768:
        # keep >= 2 token blocks so the "parallel" axis can use both v7x TCs
        tm_pref = _round_up((N8 + 1) // 2, 8)

    tm_eff, kg_auto = _choose_tiles(N8, H, k, G, itemsize, budget, tm_pref)
    if key_block_groups is None:
        kg = kg_auto
    else:
        kg = key_block_groups
        assert k % kg == 0 and (kg == k or (kg * G) % 128 == 0), \
            "key block must cover all groups or span a multiple of 128 lanes"
    kb = k // kg
    TKb = kg * G

    N_pad = _round_up(N, tm_eff)
    x = hidden_states.reshape(N, H).astype(compute_dtype)
    if N_pad != N:
        x = jnp.pad(x, ((0, N_pad - N), (0, 0)))
    Wc = W.astype(compute_dtype)
    Vc = values.astype(compute_dtype)
    b2 = b.reshape(1, total_keys).astype(jnp.float32)

    n_tok_blocks = N_pad // tm_eff
    grid = (n_tok_blocks, kb)

    flops = 4 * N_pad * H * total_keys
    bytes_accessed = int(x.size * itemsize
                         + n_tok_blocks * (Wc.size + Vc.size) * itemsize
                         + n_tok_blocks * total_keys * 4
                         + N_pad * H * 4 + N_pad * k * 8)

    kernel = functools.partial(_sparse_mlp_kernel, kg=kg, G=G, kb=kb)

    out, acts, idx = pl.pallas_call(
        kernel,
        out_shape=(
            jax.ShapeDtypeStruct((N_pad, H), jnp.float32),
            jax.ShapeDtypeStruct((N_pad, k), jnp.float32),
            jax.ShapeDtypeStruct((N_pad, k), jnp.int32),
        ),
        grid=grid,
        in_specs=[
            pl.BlockSpec((tm_eff, H), lambda i, j: (i, 0)),
            pl.BlockSpec((H, TKb), lambda i, j: (0, j)),
            pl.BlockSpec((1, TKb), lambda i, j: (0, j)),
            pl.BlockSpec((TKb, H), lambda i, j: (j, 0)),
        ],
        out_specs=(
            pl.BlockSpec((tm_eff, H), lambda i, j: (i, 0)),
            pl.BlockSpec((tm_eff, k), lambda i, j: (i, 0)),
            pl.BlockSpec((tm_eff, k), lambda i, j: (i, 0)),
        ),
        scratch_shapes=[pltpu.VMEM((tm_eff, TKb), compute_dtype)],
        compiler_params=pltpu.CompilerParams(
            dimension_semantics=("parallel", "arbitrary"),
            vmem_limit_bytes=vmem_limit),
        cost_estimate=pl.CostEstimate(flops=flops, transcendentals=0,
                                      bytes_accessed=bytes_accessed),
    )(x, Wc, b2, Vc)

    return {
        "hidden_states": out[:N].reshape(B, T, H),
        "top_indices": idx[:N].reshape(B, T, k),
        "top_acts": acts[:N].reshape(B, T, k),
    }


def _reference_forward(hidden_states, W, b, values, k, compute_dtype=jnp.float32):
    """Pure-JAX reference mirroring the torch module (and the kernel's
    compute-dtype casting when compute_dtype != f32)."""
    B, T, H = hidden_states.shape
    total_keys = W.shape[1]
    G = total_keys // k
    x = hidden_states.reshape(-1, H)
    pre = jnp.dot(x.astype(compute_dtype), W.astype(compute_dtype),
                  preferred_element_type=jnp.float32)
    pre = jnp.maximum(pre + b[None, :].astype(jnp.float32), 0.0)
    pre3 = pre.reshape(-1, k, G)
    top = pre3.max(axis=-1)
    idx = (jnp.argmax(pre3, axis=-1).astype(jnp.int32)
           + jnp.arange(k, dtype=jnp.int32) * G)
    out = jnp.einsum("nk,nkh->nh", top.astype(compute_dtype),
                     values[idx].astype(compute_dtype),
                     preferred_element_type=jnp.float32)
    return (out.reshape(B, T, H),
            idx.reshape(B, T, k),
            top.reshape(B, T, k))


if __name__ == "__main__":
    # ---- Config 1: module-consistent toy sizes ---------------------------
    #   hidden_size=32, intermediate_size=32 -> total_keys = 32*8 = 256, k=8
    B, T, H = 2, 8, 32
    intermediate_size = 32
    k = 8
    total_keys = intermediate_size * 8

    key = jax.random.PRNGKey(0)
    k_x, k_w, k_b, k_v = jax.random.split(key, 4)
    hidden_states = jax.random.normal(k_x, (B, T, H), dtype=jnp.float32)
    bound = 1.0 / math.sqrt(H)
    W = jax.random.uniform(k_w, (H, total_keys), jnp.float32, -bound, bound)
    b = jax.random.uniform(k_b, (total_keys,), jnp.float32, -bound, bound)
    values = jax.random.uniform(k_v, (total_keys, H), jnp.float32, -bound, bound)

    # f32 path: must match the pure-f32 (torch-equivalent) reference tightly.
    out32 = sparse_mlp_forward(hidden_states, W, b, values, k,
                               compute_dtype=jnp.float32)
    jax.block_until_ready(out32)
    ref_hs, ref_idx, ref_acts = _reference_forward(hidden_states, W, b, values, k)
    assert jnp.allclose(out32["hidden_states"], ref_hs, atol=1e-5, rtol=1e-5)
    assert jnp.array_equal(out32["top_indices"], ref_idx)
    assert jnp.allclose(out32["top_acts"], ref_acts, atol=1e-5, rtol=1e-5)

    # bf16 path (default): MXU-native operands, f32 accumulation/selection.
    outbf = sparse_mlp_forward(hidden_states, W, b, values, k)
    jax.block_until_ready(outbf)
    rbf_hs, _, rbf_acts = _reference_forward(hidden_states, W, b, values, k,
                                             compute_dtype=jnp.bfloat16)
    assert jnp.allclose(outbf["hidden_states"], rbf_hs, atol=2e-3, rtol=2e-3)
    assert jnp.allclose(outbf["top_acts"], rbf_acts, atol=2e-3, rtol=2e-3)

    # ---- Config 2: exercises key-axis tiling + multiple token blocks -----
    B2, T2, H2 = 2, 64, 128
    k2 = 8
    total_keys2 = 128 * 8  # intermediate_size = 128
    k_x2, k_w2, k_b2, k_v2 = jax.random.split(jax.random.PRNGKey(1), 4)
    hs2 = jax.random.normal(k_x2, (B2, T2, H2), dtype=jnp.float32)
    bound2 = 1.0 / math.sqrt(H2)
    W2 = jax.random.uniform(k_w2, (H2, total_keys2), jnp.float32, -bound2, bound2)
    b2v = jax.random.uniform(k_b2, (total_keys2,), jnp.float32, -bound2, bound2)
    values2 = jax.random.uniform(k_v2, (total_keys2, H2), jnp.float32,
                                 -bound2, bound2)

    out2 = sparse_mlp_forward(hs2, W2, b2v, values2, k2, tm=64,
                              key_block_groups=2, compute_dtype=jnp.float32)
    jax.block_until_ready(out2)
    ref2 = _reference_forward(hs2, W2, b2v, values2, k2)
    assert jnp.allclose(out2["hidden_states"], ref2[0], atol=1e-4, rtol=1e-4)
    assert jnp.array_equal(out2["top_indices"], ref2[1])
    assert jnp.allclose(out2["top_acts"], ref2[2], atol=1e-4, rtol=1e-4)

    # Auto-tiling path on config 2 (default tm / kg chosen from chip VMEM).
    out2b = sparse_mlp_forward(hs2, W2, b2v, values2, k2,
                               compute_dtype=jnp.float32)
    jax.block_until_ready(out2b)
    assert jnp.allclose(out2b["hidden_states"], ref2[0], atol=1e-4, rtol=1e-4)
    assert jnp.array_equal(out2b["top_indices"], ref2[1])
    assert jnp.allclose(out2b["top_acts"], ref2[2], atol=1e-4, rtol=1e-4)

    print("KERNEL_OK")
</pallas_src>

<mosaic_0001>
module attributes {stable_mosaic.version = 11 : i64} {
  func.func @_sparse_mlp_kernel(%arg0: i32, %arg1: i32, %arg2: memref<16x32xf32, #tpu.memory_space<vmem>>, %arg3: memref<32x256xf32, #tpu.memory_space<vmem>>, %arg4: memref<1x256xf32, #tpu.memory_space<vmem>>, %arg5: memref<256x32xf32, #tpu.memory_space<vmem>>, %arg6: memref<16x32xf32, #tpu.memory_space<vmem>>, %arg7: memref<16x8xf32, #tpu.memory_space<vmem>>, %arg8: memref<16x8xi32, #tpu.memory_space<vmem>>, %arg9: memref<16x256xf32, #tpu.memory_space<vmem>>) attributes {dimension_semantics = [#tpu.dimension_semantics<parallel>, #tpu.dimension_semantics<arbitrary>], iteration_bounds = array<i64: 1, 1>, scalar_prefetch = 0 : i64, scratch_operands = 1 : i64, tpu.core_type = #tpu.core_type<tc>, window_params = [{transform_indices = @transform_0, window_bounds = array<i64: 16, 32>}, {transform_indices = @transform_1, window_bounds = array<i64: 32, 256>}, {transform_indices = @transform_2, window_bounds = array<i64: 1, 256>}, {transform_indices = @transform_3, window_bounds = array<i64: 256, 32>}, {transform_indices = @transform_4, window_bounds = array<i64: 16, 32>}, {transform_indices = @transform_5, window_bounds = array<i64: 16, 8>}, {transform_indices = @transform_6, window_bounds = array<i64: 16, 8>}]} {
    %c0_i32 = arith.constant 0 : i32
    %0 = arith.cmpi eq, %arg1, %c0_i32 : i32
    %1 = arith.extui %0 : i1 to i32
    %c0_i32_0 = arith.constant 0 : i32
    %2 = arith.cmpi ne, %1, %c0_i32_0 : i32
    scf.if %2 {
      %cst_94 = arith.constant 0.000000e+00 : f32
      %255 = vector.broadcast %cst_94 : f32 to vector<16x32xf32>
      %c0_95 = arith.constant 0 : index
      %c0_96 = arith.constant 0 : index
      %256 = vector.load %arg6[%c0_95, %c0_96] : memref<16x32xf32, #tpu.memory_space<vmem>>, vector<16x32xf32>
      tpu.vector_store %arg6[%c0_95, %c0_96], %255 {strides = array<i32>} : memref<16x32xf32, #tpu.memory_space<vmem>>, vector<16x32xf32>,
    } else {
    }
    %c0 = arith.constant 0 : index
    %c0_1 = arith.constant 0 : index
    %3 = vector.load %arg2[%c0, %c0_1] : memref<16x32xf32, #tpu.memory_space<vmem>>, vector<16x32xf32>
    %c0_2 = arith.constant 0 : index
    %c0_3 = arith.constant 0 : index
    %4 = vector.load %arg3[%c0_2, %c0_3] : memref<32x256xf32, #tpu.memory_space<vmem>>, vector<32x256xf32>
    %cst = arith.constant dense<0.000000e+00> : vector<16x256xf32>
    %5 = tpu.matmul %3, %4, %cst {dimension_numbers = #tpu.dot_dimension_numbers<[1], [0], [0], [1], [0, 0, 1, 1], [], []>} : vector<16x32xf32>, vector<32x256xf32>, vector<16x256xf32> -> vector<16x256xf32>
    %c0_4 = arith.constant 0 : index
    %c0_5 = arith.constant 0 : index
    %6 = vector.load %arg4[%c0_4, %c0_5] : memref<1x256xf32, #tpu.memory_space<vmem>>, vector<1x256xf32>
    %7 = vector.broadcast %6 : vector<1x256xf32> to vector<16x256xf32>
    %8 = arith.addf %5, %7 : vector<16x256xf32>
    %cst_6 = arith.constant 0.000000e+00 : f32
    %9 = vector.broadcast %cst_6 : f32 to vector<16x256xf32>
    %10 = arith.maximumf %8, %9 : vector<16x256xf32>
    %11 = tpu.iota {dimensions = array<i32: 1>} : vector<16x32xi32>
    %12 = vector.extract_strided_slice %10 {offsets = [0, 0], sizes = [16, 32], strides = [1, 1]} : vector<16x256xf32> to vector<16x32xf32>
    %cst_7 = arith.constant dense<0xFF800000> : vector<16xf32>
    %13 = vector.multi_reduction <maximumf>, %12, %cst_7 [1] : vector<16x32xf32> to vector<16xf32>
    %14 = vector.shape_cast %13 : vector<16xf32> to vector<16x1xf32>
    %15 = vector.broadcast %14 : vector<16x1xf32> to vector<16x32xf32>
    %16 = arith.cmpf oeq, %12, %15 : vector<16x32xf32>
    %c32_i32 = arith.constant 32 : i32
    %17 = vector.broadcast %c32_i32 : i32 to vector<16x32xi32>
    %18 = arith.select %16, %11, %17 : vector<16x32xi1>, vector<16x32xi32>
    %cst_8 = arith.constant dense<2147483647> : vector<16xi32>
    %19 = vector.multi_reduction <minsi>, %18, %cst_8 [1] : vector<16x32xi32> to vector<16xi32>
    %20 = vector.shape_cast %19 : vector<16xi32> to vector<16x1xi32>
    %21 = vector.broadcast %20 : vector<16x1xi32> to vector<16x32xi32>
    %22 = arith.cmpi eq, %11, %21 : vector<16x32xi32>
    %cst_9 = arith.constant 0.000000e+00 : f32
    %23 = vector.broadcast %cst_9 : f32 to vector<16x32xf32>
    %24 = arith.select %22, %12, %23 : vector<16x32xi1>, vector<16x32xf32>
    %c0_10 = arith.constant 0 : index
    %c0_11 = arith.constant 0 : index
    %25 = vector.load %arg9[%c0_10, %c0_11] : memref<16x256xf32, #tpu.memory_space<vmem>>, vector<16x32xf32>
    tpu.vector_store %arg9[%c0_10, %c0_11], %24 {strides = array<i32>} : memref<16x256xf32, #tpu.memory_space<vmem>>, vector<16x32xf32>,
    %c8_i32 = arith.constant 8 : i32
    %26 = arith.muli %arg1, %c8_i32 : i32
    %c0_i32_12 = arith.constant 0 : i32
    %27 = arith.addi %26, %c0_i32_12 : i32
    %c32_i32_13 = arith.constant 32 : i32
    %28 = arith.muli %27, %c32_i32_13 : i32
    %29 = vector.broadcast %28 : i32 to vector<16x1xi32>
    %30 = arith.addi %20, %29 : vector<16x1xi32>
    %31 = vector.extract_strided_slice %10 {offsets = [0, 32], sizes = [16, 32], strides = [1, 1]} : vector<16x256xf32> to vector<16x32xf32>
    %cst_14 = arith.constant dense<0xFF800000> : vector<16xf32>
    %32 = vector.multi_reduction <maximumf>, %31, %cst_14 [1] : vector<16x32xf32> to vector<16xf32>
    %33 = vector.shape_cast %32 : vector<16xf32> to vector<16x1xf32>
    %34 = vector.broadcast %33 : vector<16x1xf32> to vector<16x32xf32>
    %35 = arith.cmpf oeq, %31, %34 : vector<16x32xf32>
    %c32_i32_15 = arith.constant 32 : i32
    %36 = vector.broadcast %c32_i32_15 : i32 to vector<16x32xi32>
    %37 = arith.select %35, %11, %36 : vector<16x32xi1>, vector<16x32xi32>
    %cst_16 = arith.constant dense<2147483647> : vector<16xi32>
    %38 = vector.multi_reduction <minsi>, %37, %cst_16 [1] : vector<16x32xi32> to vector<16xi32>
    %39 = vector.shape_cast %38 : vector<16xi32> to vector<16x1xi32>
    %40 = vector.broadcast %39 : vector<16x1xi32> to vector<16x32xi32>
    %41 = arith.cmpi eq, %11, %40 : vector<16x32xi32>
    %cst_17 = arith.constant 0.000000e+00 : f32
    %42 = vector.broadcast %cst_17 : f32 to vector<16x32xf32>
    %43 = arith.select %41, %31, %42 : vector<16x32xi1>, vector<16x32xf32>
    %c0_18 = arith.constant 0 : index
    %c32 = arith.constant 32 : index
    %44 = vector.load %arg9[%c0_18, %c32] : memref<16x256xf32, #tpu.memory_space<vmem>>, vector<16x32xf32>
    tpu.vector_store %arg9[%c0_18, %c32], %43 {strides = array<i32>} : memref<16x256xf32, #tpu.memory_space<vmem>>, vector<16x32xf32>,
    %c8_i32_19 = arith.constant 8 : i32
    %45 = arith.muli %arg1, %c8_i32_19 : i32
    %c1_i32 = arith.constant 1 : i32
    %46 = arith.addi %45, %c1_i32 : i32
    %c32_i32_20 = arith.constant 32 : i32
    %47 = arith.muli %46, %c32_i32_20 : i32
    %48 = vector.broadcast %47 : i32 to vector<16x1xi32>
    %49 = arith.addi %39, %48 : vector<16x1xi32>
    %50 = vector.extract_strided_slice %10 {offsets = [0, 64], sizes = [16, 32], strides = [1, 1]} : vector<16x256xf32> to vector<16x32xf32>
    %cst_21 = arith.constant dense<0xFF800000> : vector<16xf32>
    %51 = vector.multi_reduction <maximumf>, %50, %cst_21 [1] : vector<16x32xf32> to vector<16xf32>
    %52 = vector.shape_cast %51 : vector<16xf32> to vector<16x1xf32>
    %53 = vector.broadcast %52 : vector<16x1xf32> to vector<16x32xf32>
    %54 = arith.cmpf oeq, %50, %53 : vector<16x32xf32>
    %c32_i32_22 = arith.constant 32 : i32
    %55 = vector.broadcast %c32_i32_22 : i32 to vector<16x32xi32>
    %56 = arith.select %54, %11, %55 : vector<16x32xi1>, vector<16x32xi32>
    %cst_23 = arith.constant dense<2147483647> : vector<16xi32>
    %57 = vector.multi_reduction <minsi>, %56, %cst_23 [1] : vector<16x32xi32> to vector<16xi32>
    %58 = vector.shape_cast %57 : vector<16xi32> to vector<16x1xi32>
    %59 = vector.broadcast %58 : vector<16x1xi32> to vector<16x32xi32>
    %60 = arith.cmpi eq, %11, %59 : vector<16x32xi32>
    %cst_24 = arith.constant 0.000000e+00 : f32
    %61 = vector.broadcast %cst_24 : f32 to vector<16x32xf32>
    %62 = arith.select %60, %50, %61 : vector<16x32xi1>, vector<16x32xf32>
    %c0_25 = arith.constant 0 : index
    %c64 = arith.constant 64 : index
    %63 = vector.load %arg9[%c0_25, %c64] : memref<16x256xf32, #tpu.memory_space<vmem>>, vector<16x32xf32>
    tpu.vector_store %arg9[%c0_25, %c64], %62 {strides = array<i32>} : memref<16x256xf32, #tpu.memory_space<vmem>>, vector<16x32xf32>,
    %c8_i32_26 = arith.constant 8 : i32
    %64 = arith.muli %arg1, %c8_i32_26 : i32
    %c2_i32 = arith.constant 2 : i32
    %65 = arith.addi %64, %c2_i32 : i32
    %c32_i32_27 = arith.constant 32 : i32
    %66 = arith.muli %65, %c32_i32_27 : i32
    %67 = vector.broadcast %66 : i32 to vector<16x1xi32>
    %68 = arith.addi %58, %67 : vector<16x1xi32>
    %69 = vector.extract_strided_slice %10 {offsets = [0, 96], sizes = [16, 32], strides = [1, 1]} : vector<16x256xf32> to vector<16x32xf32>
    %cst_28 = arith.constant dense<0xFF800000> : vector<16xf32>
    %70 = vector.multi_reduction <maximumf>, %69, %cst_28 [1] : vector<16x32xf32> to vector<16xf32>
    %71 = vector.shape_cast %70 : vector<16xf32> to vector<16x1xf32>
    %72 = vector.broadcast %71 : vector<16x1xf32> to vector<16x32xf32>
    %73 = arith.cmpf oeq, %69, %72 : vector<16x32xf32>
    %c32_i32_29 = arith.constant 32 : i32
    %74 = vector.broadcast %c32_i32_29 : i32 to vector<16x32xi32>
    %75 = arith.select %73, %11, %74 : vector<16x32xi1>, vector<16x32xi32>
    %cst_30 = arith.constant dense<2147483647> : vector<16xi32>
    %76 = vector.multi_reduction <minsi>, %75, %cst_30 [1] : vector<16x32xi32> to vector<16xi32>
    %77 = vector.shape_cast %76 : vector<16xi32> to vector<16x1xi32>
    %78 = vector.broadcast %77 : vector<16x1xi32> to vector<16x32xi32>
    %79 = arith.cmpi eq, %11, %78 : vector<16x32xi32>
    %cst_31 = arith.constant 0.000000e+00 : f32
    %80 = vector.broadcast %cst_31 : f32 to vector<16x32xf32>
    %81 = arith.select %79, %69, %80 : vector<16x32xi1>, vector<16x32xf32>
    %c0_32 = arith.constant 0 : index
    %c96 = arith.constant 96 : index
    %82 = vector.load %arg9[%c0_32, %c96] : memref<16x256xf32, #tpu.memory_space<vmem>>, vector<16x32xf32>
    tpu.vector_store %arg9[%c0_32, %c96], %81 {strides = array<i32>} : memref<16x256xf32, #tpu.memory_space<vmem>>, vector<16x32xf32>,
    %c8_i32_33 = arith.constant 8 : i32
    %83 = arith.muli %arg1, %c8_i32_33 : i32
    %c3_i32 = arith.constant 3 : i32
    %84 = arith.addi %83, %c3_i32 : i32
    %c32_i32_34 = arith.constant 32 : i32
    %85 = arith.muli %84, %c32_i32_34 : i32
    %86 = vector.broadcast %85 : i32 to vector<16x1xi32>
    %87 = arith.addi %77, %86 : vector<16x1xi32>
    %88 = vector.extract_strided_slice %10 {offsets = [0, 128], sizes = [16, 32], strides = [1, 1]} : vector<16x256xf32> to vector<16x32xf32>
    %cst_35 = arith.constant dense<0xFF800000> : vector<16xf32>
    %89 = vector.multi_reduction <maximumf>, %88, %cst_35 [1] : vector<16x32xf32> to vector<16xf32>
    %90 = vector.shape_cast %89 : vector<16xf32> to vector<16x1xf32>
    %91 = vector.broadcast %90 : vector<16x1xf32> to vector<16x32xf32>
    %92 = arith.cmpf oeq, %88, %91 : vector<16x32xf32>
    %c32_i32_36 = arith.constant 32 : i32
    %93 = vector.broadcast %c32_i32_36 : i32 to vector<16x32xi32>
    %94 = arith.select %92, %11, %93 : vector<16x32xi1>, vector<16x32xi32>
    %cst_37 = arith.constant dense<2147483647> : vector<16xi32>
    %95 = vector.multi_reduction <minsi>, %94, %cst_37 [1] : vector<16x32xi32> to vector<16xi32>
    %96 = vector.shape_cast %95 : vector<16xi32> to vector<16x1xi32>
    %97 = vector.broadcast %96 : vector<16x1xi32> to vector<16x32xi32>
    %98 = arith.cmpi eq, %11, %97 : vector<16x32xi32>
    %cst_38 = arith.constant 0.000000e+00 : f32
    %99 = vector.broadcast %cst_38 : f32 to vector<16x32xf32>
    %100 = arith.select %98, %88, %99 : vector<16x32xi1>, vector<16x32xf32>
    %c0_39 = arith.constant 0 : index
    %c128 = arith.constant 128 : index
    %101 = vector.load %arg9[%c0_39, %c128] : memref<16x256xf32, #tpu.memory_space<vmem>>, vector<16x32xf32>
    tpu.vector_store %arg9[%c0_39, %c128], %100 {strides = array<i32>} : memref<16x256xf32, #tpu.memory_space<vmem>>, vector<16x32xf32>,
    %c8_i32_40 = arith.constant 8 : i32
    %102 = arith.muli %arg1, %c8_i32_40 : i32
    %c4_i32 = arith.constant 4 : i32
    %103 = arith.addi %102, %c4_i32 : i32
    %c32_i32_41 = arith.constant 32 : i32
    %104 = arith.muli %103, %c32_i32_41 : i32
    %105 = vector.broadcast %104 : i32 to vector<16x1xi32>
    %106 = arith.addi %96, %105 : vector<16x1xi32>
    %107 = vector.extract_strided_slice %10 {offsets = [0, 160], sizes = [16, 32], strides = [1, 1]} : vector<16x256xf32> to vector<16x32xf32>
    %cst_42 = arith.constant dense<0xFF800000> : vector<16xf32>
    %108 = vector.multi_reduction <maximumf>, %107, %cst_42 [1] : vector<16x32xf32> to vector<16xf32>
    %109 = vector.shape_cast %108 : vector<16xf32> to vector<16x1xf32>
    %110 = vector.broadcast %109 : vector<16x1xf32> to vector<16x32xf32>
    %111 = arith.cmpf oeq, %107, %110 : vector<16x32xf32>
    %c32_i32_43 = arith.constant 32 : i32
    %112 = vector.broadcast %c32_i32_43 : i32 to vector<16x32xi32>
    %113 = arith.select %111, %11, %112 : vector<16x32xi1>, vector<16x32xi32>
    %cst_44 = arith.constant dense<2147483647> : vector<16xi32>
    %114 = vector.multi_reduction <minsi>, %113, %cst_44 [1] : vector<16x32xi32> to vector<16xi32>
    %115 = vector.shape_cast %114 : vector<16xi32> to vector<16x1xi32>
    %116 = vector.broadcast %115 : vector<16x1xi32> to vector<16x32xi32>
    %117 = arith.cmpi eq, %11, %116 : vector<16x32xi32>
    %cst_45 = arith.constant 0.000000e+00 : f32
    %118 = vector.broadcast %cst_45 : f32 to vector<16x32xf32>
    %119 = arith.select %117, %107, %118 : vector<16x32xi1>, vector<16x32xf32>
    %c0_46 = arith.constant 0 : index
    %c160 = arith.constant 160 : index
    %120 = vector.load %arg9[%c0_46, %c160] : memref<16x256xf32, #tpu.memory_space<vmem>>, vector<16x32xf32>
    tpu.vector_store %arg9[%c0_46, %c160], %119 {strides = array<i32>} : memref<16x256xf32, #tpu.memory_space<vmem>>, vector<16x32xf32>,
    %c8_i32_47 = arith.constant 8 : i32
    %121 = arith.muli %arg1, %c8_i32_47 : i32
    %c5_i32 = arith.constant 5 : i32
    %122 = arith.addi %121, %c5_i32 : i32
    %c32_i32_48 = arith.constant 32 : i32
    %123 = arith.muli %122, %c32_i32_48 : i32
    %124 = vector.broadcast %123 : i32 to vector<16x1xi32>
    %125 = arith.addi %115, %124 : vector<16x1xi32>
    %126 = vector.extract_strided_slice %10 {offsets = [0, 192], sizes = [16, 32], strides = [1, 1]} : vector<16x256xf32> to vector<16x32xf32>
    %cst_49 = arith.constant dense<0xFF800000> : vector<16xf32>
    %127 = vector.multi_reduction <maximumf>, %126, %cst_49 [1] : vector<16x32xf32> to vector<16xf32>
    %128 = vector.shape_cast %127 : vector<16xf32> to vector<16x1xf32>
    %129 = vector.broadcast %128 : vector<16x1xf32> to vector<16x32xf32>
    %130 = arith.cmpf oeq, %126, %129 : vector<16x32xf32>
    %c32_i32_50 = arith.constant 32 : i32
    %131 = vector.broadcast %c32_i32_50 : i32 to vector<16x32xi32>
    %132 = arith.select %130, %11, %131 : vector<16x32xi1>, vector<16x32xi32>
    %cst_51 = arith.constant dense<2147483647> : vector<16xi32>
    %133 = vector.multi_reduction <minsi>, %132, %cst_51 [1] : vector<16x32xi32> to vector<16xi32>
    %134 = vector.shape_cast %133 : vector<16xi32> to vector<16x1xi32>
    %135 = vector.broadcast %134 : vector<16x1xi32> to vector<16x32xi32>
    %136 = arith.cmpi eq, %11, %135 : vector<16x32xi32>
    %cst_52 = arith.constant 0.000000e+00 : f32
    %137 = vector.broadcast %cst_52 : f32 to vector<16x32xf32>
    %138 = arith.select %136, %126, %137 : vector<16x32xi1>, vector<16x32xf32>
    %c0_53 = arith.constant 0 : index
    %c192 = arith.constant 192 : index
    %139 = vector.load %arg9[%c0_53, %c192] : memref<16x256xf32, #tpu.memory_space<vmem>>, vector<16x32xf32>
    tpu.vector_store %arg9[%c0_53, %c192], %138 {strides = array<i32>} : memref<16x256xf32, #tpu.memory_space<vmem>>, vector<16x32xf32>,
    %c8_i32_54 = arith.constant 8 : i32
    %140 = arith.muli %arg1, %c8_i32_54 : i32
    %c6_i32 = arith.constant 6 : i32
    %141 = arith.addi %140, %c6_i32 : i32
    %c32_i32_55 = arith.constant 32 : i32
    %142 = arith.muli %141, %c32_i32_55 : i32
    %143 = vector.broadcast %142 : i32 to vector<16x1xi32>
    %144 = arith.addi %134, %143 : vector<16x1xi32>
    %145 = vector.extract_strided_slice %10 {offsets = [0, 224], sizes = [16, 32], strides = [1, 1]} : vector<16x256xf32> to vector<16x32xf32>
    %cst_56 = arith.constant dense<0xFF800000> : vector<16xf32>
    %146 = vector.multi_reduction <maximumf>, %145, %cst_56 [1] : vector<16x32xf32> to vector<16xf32>
    %147 = vector.shape_cast %146 : vector<16xf32> to vector<16x1xf32>
    %148 = vector.broadcast %147 : vector<16x1xf32> to vector<16x32xf32>
    %149 = arith.cmpf oeq, %145, %148 : vector<16x32xf32>
    %c32_i32_57 = arith.constant 32 : i32
    %150 = vector.broadcast %c32_i32_57 : i32 to vector<16x32xi32>
    %151 = arith.select %149, %11, %150 : vector<16x32xi1>, vector<16x32xi32>
    %cst_58 = arith.constant dense<2147483647> : vector<16xi32>
    %152 = vector.multi_reduction <minsi>, %151, %cst_58 [1] : vector<16x32xi32> to vector<16xi32>
    %153 = vector.shape_cast %152 : vector<16xi32> to vector<16x1xi32>
    %154 = vector.broadcast %153 : vector<16x1xi32> to vector<16x32xi32>
    %155 = arith.cmpi eq, %11, %154 : vector<16x32xi32>
    %cst_59 = arith.constant 0.000000e+00 : f32
    %156 = vector.broadcast %cst_59 : f32 to vector<16x32xf32>
    %157 = arith.select %155, %145, %156 : vector<16x32xi1>, vector<16x32xf32>
    %c0_60 = arith.constant 0 : index
    %c224 = arith.constant 224 : index
    %158 = vector.load %arg9[%c0_60, %c224] : memref<16x256xf32, #tpu.memory_space<vmem>>, vector<16x32xf32>
    tpu.vector_store %arg9[%c0_60, %c224], %157 {strides = array<i32>} : memref<16x256xf32, #tpu.memory_space<vmem>>, vector<16x32xf32>,
    %c8_i32_61 = arith.constant 8 : i32
    %159 = arith.muli %arg1, %c8_i32_61 : i32
    %c7_i32 = arith.constant 7 : i32
    %160 = arith.addi %159, %c7_i32 : i32
    %c32_i32_62 = arith.constant 32 : i32
    %161 = arith.muli %160, %c32_i32_62 : i32
    %162 = vector.broadcast %161 : i32 to vector<16x1xi32>
    %163 = arith.addi %153, %162 : vector<16x1xi32>
    %c0_63 = arith.constant 0 : index
    %c0_64 = arith.constant 0 : index
    %164 = vector.load %arg6[%c0_63, %c0_64] : memref<16x32xf32, #tpu.memory_space<vmem>>, vector<16x32xf32>
    %c0_65 = arith.constant 0 : index
    %c0_66 = arith.constant 0 : index
    %165 = vector.load %arg9[%c0_65, %c0_66] : memref<16x256xf32, #tpu.memory_space<vmem>>, vector<16x256xf32>
    %c0_67 = arith.constant 0 : index
    %c0_68 = arith.constant 0 : index
    %166 = vector.load %arg5[%c0_67, %c0_68] : memref<256x32xf32, #tpu.memory_space<vmem>>, vector<256x32xf32>
    %cst_69 = arith.constant dense<0.000000e+00> : vector<16x32xf32>
    %167 = tpu.matmul %165, %166, %cst_69 {dimension_numbers = #tpu.dot_dimension_numbers<[1], [0], [0], [1], [0, 0, 1, 1], [], []>} : vector<16x256xf32>, vector<256x32xf32>, vector<16x32xf32> -> vector<16x32xf32>
    %168 = arith.addf %164, %167 : vector<16x32xf32>
    %c0_70 = arith.constant 0 : index
    %c0_71 = arith.constant 0 : index
    %169 = vector.load %arg6[%c0_70, %c0_71] : memref<16x32xf32, #tpu.memory_space<vmem>>, vector<16x32xf32>
    tpu.vector_store %arg6[%c0_70, %c0_71], %168 {strides = array<i32>} : memref<16x32xf32, #tpu.memory_space<vmem>>, vector<16x32xf32>,
    %170 = tpu.iota {dimensions = array<i32: 1>} : vector<16x8xi32>
    %cst_72 = arith.constant 0.000000e+00 : f32
    %171 = vector.broadcast %cst_72 : f32 to vector<16x8xf32>
    %c0_i32_73 = arith.constant 0 : i32
    %172 = vector.broadcast %c0_i32_73 : i32 to vector<16x8xi32>
    %c8_i32_74 = arith.constant 8 : i32
    %173 = arith.muli %arg1, %c8_i32_74 : i32
    %c0_i32_75 = arith.constant 0 : i32
    %174 = arith.addi %173, %c0_i32_75 : i32
    %175 = vector.broadcast %174 : i32 to vector<16x8xi32>
    %176 = arith.cmpi eq, %170, %175 : vector<16x8xi32>
    %177 = vector.shape_cast %14 : vector<16x1xf32> to vector<16x1xf32>
    %178 = vector.broadcast %177 : vector<16x1xf32> to vector<16x8xf32>
    %179 = arith.select %176, %178, %171 : vector<16x8xi1>, vector<16x8xf32>
    %180 = vector.shape_cast %30 : vector<16x1xi32> to vector<16x1xi32>
    %181 = vector.broadcast %180 : vector<16x1xi32> to vector<16x8xi32>
    %182 = arith.select %176, %181, %172 : vector<16x8xi1>, vector<16x8xi32>
    %c8_i32_76 = arith.constant 8 : i32
    %183 = arith.muli %arg1, %c8_i32_76 : i32
    %c1_i32_77 = arith.constant 1 : i32
    %184 = arith.addi %183, %c1_i32_77 : i32
    %185 = vector.broadcast %184 : i32 to vector<16x8xi32>
    %186 = arith.cmpi eq, %170, %185 : vector<16x8xi32>
    %187 = vector.shape_cast %33 : vector<16x1xf32> to vector<16x1xf32>
    %188 = vector.broadcast %187 : vector<16x1xf32> to vector<16x8xf32>
    %189 = arith.select %186, %188, %179 : vector<16x8xi1>, vector<16x8xf32>
    %190 = vector.shape_cast %49 : vector<16x1xi32> to vector<16x1xi32>
    %191 = vector.broadcast %190 : vector<16x1xi32> to vector<16x8xi32>
    %192 = arith.select %186, %191, %182 : vector<16x8xi1>, vector<16x8xi32>
    %c8_i32_78 = arith.constant 8 : i32
    %193 = arith.muli %arg1, %c8_i32_78 : i32
    %c2_i32_79 = arith.constant 2 : i32
    %194 = arith.addi %193, %c2_i32_79 : i32
    %195 = vector.broadcast %194 : i32 to vector<16x8xi32>
    %196 = arith.cmpi eq, %170, %195 : vector<16x8xi32>
    %197 = vector.shape_cast %52 : vector<16x1xf32> to vector<16x1xf32>
    %198 = vector.broadcast %197 : vector<16x1xf32> to vector<16x8xf32>
    %199 = arith.select %196, %198, %189 : vector<16x8xi1>, vector<16x8xf32>
    %200 = vector.shape_cast %68 : vector<16x1xi32> to vector<16x1xi32>
    %201 = vector.broadcast %200 : vector<16x1xi32> to vector<16x8xi32>
    %202 = arith.select %196, %201, %192 : vector<16x8xi1>, vector<16x8xi32>
    %c8_i32_80 = arith.constant 8 : i32
    %203 = arith.muli %arg1, %c8_i32_80 : i32
    %c3_i32_81 = arith.constant 3 : i32
    %204 = arith.addi %203, %c3_i32_81 : i32
    %205 = vector.broadcast %204 : i32 to vector<16x8xi32>
    %206 = arith.cmpi eq, %170, %205 : vector<16x8xi32>
    %207 = vector.shape_cast %71 : vector<16x1xf32> to vector<16x1xf32>
    %208 = vector.broadcast %207 : vector<16x1xf32> to vector<16x8xf32>
    %209 = arith.select %206, %208, %199 : vector<16x8xi1>, vector<16x8xf32>
    %210 = vector.shape_cast %87 : vector<16x1xi32> to vector<16x1xi32>
    %211 = vector.broadcast %210 : vector<16x1xi32> to vector<16x8xi32>
    %212 = arith.select %206, %211, %202 : vector<16x8xi1>, vector<16x8xi32>
    %c8_i32_82 = arith.constant 8 : i32
    %213 = arith.muli %arg1, %c8_i32_82 : i32
    %c4_i32_83 = arith.constant 4 : i32
    %214 = arith.addi %213, %c4_i32_83 : i32
    %215 = vector.broadcast %214 : i32 to vector<16x8xi32>
    %216 = arith.cmpi eq, %170, %215 : vector<16x8xi32>
    %217 = vector.shape_cast %90 : vector<16x1xf32> to vector<16x1xf32>
    %218 = vector.broadcast %217 : vector<16x1xf32> to vector<16x8xf32>
    %219 = arith.select %216, %218, %209 : vector<16x8xi1>, vector<16x8xf32>
    %220 = vector.shape_cast %106 : vector<16x1xi32> to vector<16x1xi32>
    %221 = vector.broadcast %220 : vector<16x1xi32> to vector<16x8xi32>
    %222 = arith.select %216, %221, %212 : vector<16x8xi1>, vector<16x8xi32>
    %c8_i32_84 = arith.constant 8 : i32
    %223 = arith.muli %arg1, %c8_i32_84 : i32
    %c5_i32_85 = arith.constant 5 : i32
    %224 = arith.addi %223, %c5_i32_85 : i32
    %225 = vector.broadcast %224 : i32 to vector<16x8xi32>
    %226 = arith.cmpi eq, %170, %225 : vector<16x8xi32>
    %227 = vector.shape_cast %109 : vector<16x1xf32> to vector<16x1xf32>
    %228 = vector.broadcast %227 : vector<16x1xf32> to vector<16x8xf32>
    %229 = arith.select %226, %228, %219 : vector<16x8xi1>, vector<16x8xf32>
    %230 = vector.shape_cast %125 : vector<16x1xi32> to vector<16x1xi32>
    %231 = vector.broadcast %230 : vector<16x1xi32> to vector<16x8xi32>
    %232 = arith.select %226, %231, %222 : vector<16x8xi1>, vector<16x8xi32>
    %c8_i32_86 = arith.constant 8 : i32
    %233 = arith.muli %arg1, %c8_i32_86 : i32
    %c6_i32_87 = arith.constant 6 : i32
    %234 = arith.addi %233, %c6_i32_87 : i32
    %235 = vector.broadcast %234 : i32 to vector<16x8xi32>
    %236 = arith.cmpi eq, %170, %235 : vector<16x8xi32>
    %237 = vector.shape_cast %128 : vector<16x1xf32> to vector<16x1xf32>
    %238 = vector.broadcast %237 : vector<16x1xf32> to vector<16x8xf32>
    %239 = arith.select %236, %238, %229 : vector<16x8xi1>, vector<16x8xf32>
    %240 = vector.shape_cast %144 : vector<16x1xi32> to vector<16x1xi32>
    %241 = vector.broadcast %240 : vector<16x1xi32> to vector<16x8xi32>
    %242 = arith.select %236, %241, %232 : vector<16x8xi1>, vector<16x8xi32>
    %c8_i32_88 = arith.constant 8 : i32
    %243 = arith.muli %arg1, %c8_i32_88 : i32
    %c7_i32_89 = arith.constant 7 : i32
    %244 = arith.addi %243, %c7_i32_89 : i32
    %245 = vector.broadcast %244 : i32 to vector<16x8xi32>
    %246 = arith.cmpi eq, %170, %245 : vector<16x8xi32>
    %247 = vector.shape_cast %147 : vector<16x1xf32> to vector<16x1xf32>
    %248 = vector.broadcast %247 : vector<16x1xf32> to vector<16x8xf32>
    %249 = arith.select %246, %248, %239 : vector<16x8xi1>, vector<16x8xf32>
    %250 = vector.shape_cast %163 : vector<16x1xi32> to vector<16x1xi32>
    %251 = vector.broadcast %250 : vector<16x1xi32> to vector<16x8xi32>
    %252 = arith.select %246, %251, %242 : vector<16x8xi1>, vector<16x8xi32>
    %c0_90 = arith.constant 0 : index
    %c0_91 = arith.constant 0 : index
    %253 = vector.load %arg7[%c0_90, %c0_91] : memref<16x8xf32, #tpu.memory_space<vmem>>, vector<16x8xf32>
    tpu.vector_store %arg7[%c0_90, %c0_91], %249 {strides = array<i32>} : memref<16x8xf32, #tpu.memory_space<vmem>>, vector<16x8xf32>,
    %c0_92 = arith.constant 0 : index
    %c0_93 = arith.constant 0 : index
    %254 = vector.load %arg8[%c0_92, %c0_93] : memref<16x8xi32, #tpu.memory_space<vmem>>, vector<16x8xi32>
    tpu.vector_store %arg8[%c0_92, %c0_93], %252 {strides = array<i32>} : memref<16x8xi32, #tpu.memory_space<vmem>>, vector<16x8xi32>,
    return
  }
  func.func @transform_0(%arg0: i32, %arg1: i32) -> (i32, i32) {
    %c0_i32 = arith.constant 0 : i32
    %c0_i32_0 = arith.constant 0 : i32
    return %arg0, %c0_i32 : i32, i32
  }
  func.func @transform_1(%arg0: i32, %arg1: i32) -> (i32, i32) {
    %c0_i32 = arith.constant 0 : i32
    %c0_i32_0 = arith.constant 0 : i32
    return %c0_i32, %arg1 : i32, i32
  }
  func.func @transform_2(%arg0: i32, %arg1: i32) -> (i32, i32) {
    %c0_i32 = arith.constant 0 : i32
    %c0_i32_0 = arith.constant 0 : i32
    return %c0_i32, %arg1 : i32, i32
  }
  func.func @transform_3(%arg0: i32, %arg1: i32) -> (i32, i32) {
    %c0_i32 = arith.constant 0 : i32
    %c0_i32_0 = arith.constant 0 : i32
    return %arg1, %c0_i32 : i32, i32
  }
  func.func @transform_4(%arg0: i32, %arg1: i32) -> (i32, i32) {
    %c0_i32 = arith.constant 0 : i32
    %c0_i32_0 = arith.constant 0 : i32
    return %arg0, %c0_i32 : i32, i32
  }
  func.func @transform_5(%arg0: i32, %arg1: i32) -> (i32, i32) {
    %c0_i32 = arith.constant 0 : i32
    %c0_i32_0 = arith.constant 0 : i32
    return %arg0, %c0_i32 : i32, i32
  }
  func.func @transform_6(%arg0: i32, %arg1: i32) -> (i32, i32) {
    %c0_i32 = arith.constant 0 : i32
    %c0_i32_0 = arith.constant 0 : i32
    return %arg0, %c0_i32 : i32, i32
  }
}

</mosaic_0001>

<bundles_post_ra>
// kernel: tpu_custom_call.1
= control target key start
LH: loop header
LB: loop body
LE: loop exit
PB: predicated region body
PF: predicated region fallthrough
CT: control target
= control target key end

     0   :  { %vm25_vm0 = vcmask 261120   ;;  %v40_v3 = vlaneseq  ;;  %v908_v5 = vmov 0.0   ;;  %s1620_s0 = inlined_call_operand.vmem [shape: f32[16,32], index: 0, kind: input, shape index: {}]   ;;  %s1621_s1 = inlined_call_operand.vmem [shape: f32[32,256], index: 1, kind: input, shape index: {}]   ;;  %s1622_s2 = inlined_call_operand.vmem [shape: f32[1,256], index: 2, kind: input, shape index: {}]   ;;  %s1623_s3 = inlined_call_operand.vmem [shape: f32[256,32], index: 3, kind: input, shape index: {}]   ;;  %s1624_s4 = inlined_call_operand.hbm [shape: f32[16,32], index: 4, kind: output, shape index: {0}]   ;;  %s1625_s5 = inlined_call_operand.vmem [shape: f32[16,8], index: 5, kind: output, shape index: {1}]   ;;  %s1626_s6 = inlined_call_operand.vmem [shape: s32[16,8], index: 6, kind: output, shape index: {2}]  }
   0x1   :  { %v37_v0 = vld [vmem:[%s1621_s1 + $0x38] sm:$0xff]  ;;  %v36_v1 = vld [vmem:[%s1621_s1 + $0x30] sm:$0xff]  ;;  %v35_v2 = vld [vmem:[%s1621_s1 + $0x28] sm:$0xff]  ;;  %26 = vst.msk [vmem:[#allocation3] sm:$0xff] %vm25_vm0, %v908_v5  ;;  %121 = vmatprep.mubr.f32.mxu0 %v908_v5 }
   0x2   :  { %81 = vmatprep.subr.mxu0 %v37_v0  ;;  %v34_v4 = vld [vmem:[%s1621_s1 + $0x20] sm:$0xff]  ;;  %27 = vst.msk [vmem:[#allocation3 + $0x8] sm:$0xff] %vm25_vm0, %v908_v5  ;;  %v33_v6 = vld [vmem:[%s1621_s1 + $0x18] sm:$0xff]  ;;  %v967_v7 = vand.u32 127, %v40_v3  ;;  %v32_v8 = vld [vmem:[%s1621_s1 + $0x10] sm:$0xff] }
   0x3   :  { %82 = vmatpush1.msra.mxu0 %v36_v1 }
   0x4   :  { %83 = vmatprep.subr.mxu0 %v35_v2 }
   0x5   :  { %12 = vsyncpa [#allocation4], 0  ;;  %84 = vmatpush1.msra.mxu0 %v34_v4  ;;  %v31_v9 = vld [vmem:[%s1621_s1 + $0x8] sm:$0xff]  ;;  %s909_s11 = smov 64   ;;  %v30_v10 = vld [vmem:[%s1621_s1] sm:$0xff]  ;;  %s910_s18 = smov 96  }
   0x6   :  { %270 = vrot.lane.b32.xlu1 %v967_v7, %s909_s11  ;;  %85 = vmatprep.subr.mxu0 %v33_v6  ;;  %v28_v11 = vld [vmem:[%s1620_s0] sm:$0xff]  ;;  %v29_v12 = vld [vmem:[%s1620_s0 + $0x8] sm:$0xff]  ;;  %s911_s1 = smov 32   ;;  %v41_v13 = vshrl.u32 %v40_v3, 7  ;;  %vm190_vm1 = vcmask 523520   ;;  %vm261_vm2 = vcmask 785920  }
   0x7   :  { %86 = vmatpush1.msra.mxu0 %v32_v8  ;;  %199 = vrot.lane.b32.xlu0 %v967_v7, %s911_s1  ;;  %v38_v15 = vld [vmem:[%s1622_s2] sm:$0x3]  ;;  %vm329_vm3 = vcmask 1048320   ;;  %vm763_vm6 = vcmp.eq.s32.totalorder %v967_v7, 0  ;;  %vm769_vm7 = vcmp.eq.s32.totalorder %v967_v7, 1  ;;  %vm775_vm8 = vcmp.eq.s32.totalorder %v967_v7, 2 }
   0x8   :  { %87 = vmatprep.subr.mxu0 %v31_v9  ;;  %v42_v14 = vsub.s32 0, %v41_v13  ;;  %v46_v20 = vsub.s32 1, %v41_v13  ;;  %vm781_vm13 = vcmp.eq.s32.totalorder %v967_v7, 3  ;;  %vm787_vm15 = vcmp.eq.s32.totalorder %v967_v7, 4 }
   0x9   :  { %88 = vmatpush1.msra.mxu0 %v30_v10 }
   0xa   :  { %839 = vmatmul.mubr.msk.f32.vlgmr.msra.gmra.mxu0 %vm25_vm0, %v28_v11  ;;  %338 = vrot.lane.b32.xlu1 %v967_v7, %s910_s18  ;;  %v43_v16 = vrot.slane %v38_v15, %v42_v14  ;;  %v47_v21 = vrot.slane %v38_v15, %v46_v20 }
   0xb   :  { %127 = vmatprep.mubr.f32.mxu0 %v908_v5 }
   0xe   :  { %840 = vmatmul.mubr.msk.f32.gmra.mxu0 %vm25_vm0, %v29_v12 }
  0x78   :  { %v1053_v48 = vpop.permute.xlu1 %270 }
  0x79   :  { %v1051_v47 = vpop.permute.xlu0 %199 }
  0x7c   :  { %v1057_v50 = vpop.permute.xlu1 %338 }
  0xca   :  { %v123_v17 = vpop.f32.mrf.mxu0 }
  0xcb   :  { %v124_v18 = vadd.f32 %v123_v17, %v43_v16 }
  0xcc   :  { %v125_v22 = vpop.f32.mrf.mxu0 }
  0xcd   :  { %v995_v19 = vmax.f32 %v124_v18, 0.0  ;;  %v126_v23 = vadd.f32 %v125_v22, %v47_v21 }
  0xce   :  { %v129_v26 = vpop.f32.mrf.mxu0 }
  0xcf   :  { %306 = vrot.lane.b32.xlu1 %v995_v19, %s909_s11  ;;  %237 = vrot.lane.b32.xlu0 %v995_v19, %s910_s18  ;;  %v191_v24 = vsel %vm190_vm1, %v995_v19, -inf  ;;  %v262_v25 = vsel %vm261_vm2, %v995_v19, -inf  ;;  %v1007_v27 = vmax.f32 %v126_v23, 0.0  ;;  %v140_v28 = vsel %vm25_vm0, %v995_v19, -inf }
  0xd0   :  { %v330_v29 = vsel %vm329_vm3, %v995_v19, -inf  ;;  %v130_v30 = vadd.f32 %v129_v26, %v43_v16  ;;  %v131_v31 = vpop.f32.mrf.mxu0 }
  0xd1   :  { %v448_v32 = vsel %vm190_vm1, %v1007_v27, -inf  ;;  %v132_v34 = vadd.f32 %v131_v31, %v47_v21  ;;  %v580_v35 = vsel %vm329_vm3, %v1007_v27, -inf  ;;  %v515_v41 = vsel %vm261_vm2, %v1007_v27, -inf }
  0xd2   :  { %v1015_v33 = vmax.f32 %v130_v30, 0.0  ;;  %v397_v42 = vsel %vm25_vm0, %v1007_v27, -inf }
  0xd3   :  { %374 = vrot.lane.b32.xlu0 %v995_v19, %s911_s1  ;;  %v1019_v36 = vmax.f32 %v132_v34, 0.0 }
  0xd4   :  { %v143_v37 = vsel %vm25_vm0, %v1015_v33, -inf  ;;  %v194_v43 = vsel %vm190_vm1, %v1015_v33, -inf  ;;  %v265_v44 = vsel %vm261_vm2, %v1015_v33, -inf  ;;  %v333_v46 = vsel %vm329_vm3, %v1015_v33, -inf }
  0xd5   :  { %v451_v38 = vsel %vm190_vm1, %v1019_v36, -inf  ;;  %v518_v39 = vsel %vm261_vm2, %v1019_v36, -inf  ;;  %v583_v40 = vsel %vm329_vm3, %v1019_v36, -inf  ;;  %v400_v45 = vsel %vm25_vm0, %v1019_v36, -inf }
  0xf2   :  { %192 = vmax.xlane.f32.xlu0 %v191_v24 }
  0xf3   :  { %263 = vmax.xlane.f32.xlu1 %v262_v25 }
  0xf6   :  { %141 = vmax.xlane.f32.xlu0 %v140_v28 }
  0xf7   :  { %331 = vmax.xlane.f32.xlu1 %v330_v29 }
  0xfa   :  { %449 = vmax.xlane.f32.xlu0 %v448_v32 }
  0xfe   :  { %581 = vmax.xlane.f32.xlu0 %v580_v35 }
 0x102   :  { %144 = vmax.xlane.f32.xlu0 %v143_v37 }
 0x106   :  { %452 = vmax.xlane.f32.xlu0 %v451_v38 }
 0x108   :  { %492 = vrot.lane.b32.xlu1 %v1007_v27, %s910_s18 }
 0x10a   :  { %519 = vmax.xlane.f32.xlu0 %v518_v39 }
 0x10c   :  { %557 = vrot.lane.b32.xlu1 %v1007_v27, %s909_s11 }
 0x10e   :  { %584 = vmax.xlane.f32.xlu0 %v583_v40 }
 0x110   :  { %622 = vrot.lane.b32.xlu1 %v1007_v27, %s911_s1 }
 0x124   :  { %239 = vrot.lane.b32.xlu0 %v1015_v33, %s910_s18 }
 0x134   :  { %516 = vmax.xlane.f32.xlu1 %v515_v41 }
 0x138   :  { %398 = vmax.xlane.f32.xlu1 %v397_v42 }
 0x13c   :  { %195 = vmax.xlane.f32.xlu1 %v194_v43 }
 0x140   :  { %266 = vmax.xlane.f32.xlu1 %v265_v44 }
 0x141   :  { %v1055_v49 = vpop.permute.xlu0 %237  ;;  %v1061_v52 = vpop.permute.xlu1 %306 }
 0x143   :  { %401 = vmax.xlane.f32.xlu0 %v400_v45 }
 0x144   :  { %334 = vmax.xlane.f32.xlu1 %v333_v46 }
 0x145   :  { %v1059_v51 = vpop.permute.xlu0 %374 }
 0x155   :  { %494 = vrot.lane.b32.xlu1 %v1019_v36, %s910_s18 }
 0x17b   :  { %v193_v53 = vpop.xlane.xlu0 %192 }
 0x17c   :  { %vm197_vm4 = vcmp.eq.f32.partialorder %v995_v19, %v193_v53  ;;  %v264_v54 = vpop.xlane.xlu1 %263 }
 0x17d   :  { %v201_v55 = vsel %vm197_vm4, %v1051_v47, 32  ;;  %vm268_vm5 = vcmp.eq.f32.partialorder %v995_v19, %v264_v54  ;;  %vm793_vm4 = vcmp.eq.s32.totalorder %v967_v7, 5 }
 0x17e   :  { %v272_v56 = vsel %vm268_vm5, %v1053_v48, 32  ;;  %v1070_v57 = vsel %vm190_vm1, %v201_v55, 2147483647 }
 0x17f   :  { %v142_v58 = vpop.xlane.xlu0 %141  ;;  %v205_v59 = vshra.s32 %v1070_v57, 16  ;;  %v1075_v60 = vsel %vm261_vm2, %v272_v56, 2147483647 }
 0x180   :  { %vm146_vm9 = vcmp.eq.f32.partialorder %v995_v19, %v142_v58  ;;  %v764_v61 = vsel %vm763_vm6, %v142_v58, 0.0  ;;  %v332_v62 = vpop.xlane.xlu1 %331  ;;  %v276_v1 = vshra.s32 %v1075_v60, 16 }
 0x181   :  { %v770_v63 = vsel %vm769_vm7, %v193_v53, %v764_v61  ;;  %vm336_vm10 = vcmp.eq.f32.partialorder %v995_v19, %v332_v62  ;;  %v1083_v0 = vcvt.s32.f32 %v205_v59  ;;  %v148_v4 = vsel %vm146_vm9, %v967_v7, 32 }
 0x182   :  { %v340_v2 = vsel %vm336_vm10, %v1057_v50, 32  ;;  %v776_v3 = vsel %vm775_vm8, %v264_v54, %v770_v63  ;;  %v1096_v9 = vcvt.s32.f32 %v276_v1  ;;  %v1103_v12 = vsel %vm25_vm0, %v148_v4, 2147483647 }
 0x183   :  { %208 = vmin.xlane.f32.xlu0 %v1083_v0  ;;  %v450_v5 = vpop.xlane.xlu0 %449  ;;  %v1092_v6 = vsel %vm329_vm3, %v340_v2, 2147483647  ;;  %v152_v16 = vshra.s32 %v1103_v12, 16  ;;  %v782_v32 = vsel %vm781_vm13, %v332_v62, %v776_v3  ;;  %vm799_vm9 = vcmp.eq.s32.totalorder %v967_v7, 6 }
 0x184   :  { %vm454_vm11 = vcmp.eq.f32.partialorder %v1007_v27, %v450_v5  ;;  %v344_v10 = vshra.s32 %v1092_v6, 16  ;;  %v1117_v18 = vpop.permute.xlu1 %492  ;;  %vm805_vm10 = vcmp.eq.s32.totalorder %v967_v7, 7 }
 0x185   :  { %v456_v8 = vsel %vm454_vm11, %v1051_v47, 32  ;;  %v1114_v17 = vcvt.s32.f32 %v152_v16  ;;  %vm1627_vm11 = vcmask 64512  }
 0x186   :  { %v1100_v11 = vsel %vm190_vm1, %v456_v8, 2147483647  ;;  %v1107_v14 = vcvt.s32.f32 %v344_v10 }
 0x187   :  { %279 = vmin.xlane.f32.xlu0 %v1096_v9  ;;  %v460_v13 = vshra.s32 %v1100_v11, 16  ;;  %v582_v20 = vpop.xlane.xlu0 %581 }
 0x188   :  { %v1119_v21 = vpop.permute.xlu1 %557  ;;  %vm586_vm12 = vcmp.eq.f32.partialorder %v1007_v27, %v582_v20 }
 0x189   :  { %v1109_v15 = vcvt.s32.f32 %v460_v13  ;;  %v588_v25 = vsel %vm586_vm12, %v1057_v50, 32 }
 0x18a   :  { %v1138_v31 = vsel %vm329_vm3, %v588_v25, 2147483647 }
 0x18b   :  { %347 = vmin.xlane.f32.xlu0 %v1107_v14  ;;  %463 = vmin.xlane.f32.xlu1 %v1109_v15  ;;  %v145_v22 = vpop.xlane.xlu0 %144  ;;  %v592_v41 = vshra.s32 %v1138_v31, 16 }
 0x18c   :  { %v1121_v23 = vpop.permute.xlu1 %622  ;;  %v765_v61 = vsel %vm763_vm6, %v145_v22, 0.0 }
 0x18d   :  { %v1173_v55 = vcvt.s32.f32 %v592_v41 }
 0x18f   :  { %155 = vmin.xlane.f32.xlu0 %v1114_v17  ;;  %v1124_v24 = vpop.xlane.xlu0 %452 }
 0x190   :  { %vm455_vm5 = vcmp.eq.f32.partialorder %v1019_v36, %v1124_v24 }
 0x191   :  { %v457_v42 = vsel %vm455_vm5, %v1051_v47, 32 }
 0x192   :  { %v1177_v58 = vsel %vm190_vm1, %v457_v42, 2147483647 }
 0x193   :  { %v1131_v29 = vpop.xlane.xlu0 %519  ;;  %v475_v2 = vshra.s32 %v1177_v58, 16 }
 0x197   :  { %v585_v53 = vpop.xlane.xlu0 %584 }
 0x19b   :  { %v1189_v1 = vpop.permute.xlu0 %239 }
 0x1bd   :  { %v517_v26 = vpop.xlane.xlu1 %516 }
 0x1be   :  { %vm521_vm14 = vcmp.eq.f32.partialorder %v1007_v27, %v517_v26 }
 0x1bf   :  { %v523_v28 = vsel %vm521_vm14, %v1053_v48, 32  ;;  %vm522_vm14 = vcmp.eq.f32.partialorder %v1019_v36, %v1131_v29 }
 0x1c0   :  { %v1135_v30 = vsel %vm261_vm2, %v523_v28, 2147483647  ;;  %v524_v62 = vsel %vm522_vm14, %v1053_v48, 32  ;;  %vm1628_vm14 = vcmask 64512  }
 0x1c1   :  { %v399_v34 = vpop.xlane.xlu1 %398  ;;  %v527_v35 = vshra.s32 %v1135_v30, 16  ;;  %v1204_v13 = vsel %vm261_vm2, %v524_v62, 2147483647 }
 0x1c2   :  { %vm403_vm12 = vcmp.eq.f32.partialorder %v1007_v27, %v399_v34  ;;  %v788_v37 = vsel %vm787_vm15, %v399_v34, %v782_v32  ;;  %v1216_v32 = vcvt.s32.f32 %v475_v2  ;;  %v204_v2 = vand.u32 65535, %v1070_v57 }
 0x1c3   :  { %v405_v38 = vsel %vm403_vm12, %v967_v7, 32  ;;  %v794_v39 = vsel %vm793_vm4, %v450_v5, %v788_v37  ;;  %v1153_v40 = vcvt.s32.f32 %v527_v35  ;;  %vm147_vm12 = vcmp.eq.f32.partialorder %v1015_v33, %v145_v22 }
 0x1c4   :  { %v800_v43 = vsel %vm799_vm9, %v517_v26, %v794_v39  ;;  %v1160_v44 = vsel %vm25_vm0, %v405_v38, 2147483647  ;;  %v149_v16 = vsel %vm147_vm12, %v967_v7, 32  ;;  %v542_v38 = vshra.s32 %v1204_v13, 16 }
 0x1c5   :  { %v806_v45 = vsel %vm805_vm10, %v582_v20, %v800_v43  ;;  %v196_v46 = vpop.xlane.xlu1 %195  ;;  %530 = vmin.xlane.f32.xlu1 %v1153_v40  ;;  %v409_v56 = vshra.s32 %v1160_v44, 16  ;;  %v1231_v42 = vsel %vm25_vm0, %v149_v16, 2147483647  ;;  %v206_v16 = vcvt.s32.f32 %v204_v2 }
 0x1c6   :  { %811 = vst.msk [vmem:[%s1625_s5] sm:$0xff] %vm1627_vm11, %v806_v45  ;;  %vm198_vm5 = vcmp.eq.f32.partialorder %v1015_v33, %v196_v46  ;;  %v771_v8 = vsel %vm769_vm7, %v196_v46, %v765_v61  ;;  %v459_v57 = vand.u32 65535, %v1100_v11 }
 0x1c7   :  { %v202_v54 = vsel %vm198_vm5, %v1051_v47, 32  ;;  %vm587_vm5 = vcmp.eq.f32.partialorder %v1019_v36, %v585_v53  ;;  %v1196_v5 = vcvt.s32.f32 %v409_v56 }
 0x1c8   :  { %v1180_v59 = vsel %vm190_vm1, %v202_v54, 2147483647  ;;  %v589_v20 = vsel %vm587_vm5, %v1057_v50, 32  ;;  %v1250_v54 = vcvt.s32.f32 %v542_v38 }
 0x1c9   :  { %v267_v63 = vpop.xlane.xlu1 %266  ;;  %595 = vmin.xlane.f32.xlu1 %v1173_v55  ;;  %v220_v47 = vshra.s32 %v1180_v59, 16  ;;  %v1234_v43 = vsel %vm329_vm3, %v589_v20, 2147483647  ;;  %v275_v20 = vand.u32 65535, %v1075_v60 }
 0x1ca   :  { %vm269_vm11 = vcmp.eq.f32.partialorder %v1015_v33, %v267_v63  ;;  %v607_v56 = vshra.s32 %v1234_v43, 16 }
 0x1cb   :  { %v273_v3 = vsel %vm269_vm11, %v1053_v48, 32  ;;  %v1194_v4 = vcvt.s32.f32 %v220_v47  ;;  %v777_v48 = vsel %vm775_vm8, %v267_v63, %v771_v8 }
 0x1cc   :  { %v1201_v10 = vsel %vm261_vm2, %v273_v3, 2147483647  ;;  %v402_v26 = vpop.xlane.xlu0 %401 }
 0x1cd   :  { %v335_v22 = vpop.xlane.xlu1 %334  ;;  %223 = vmin.xlane.f32.xlu0 %v1194_v4  ;;  %412 = vmin.xlane.f32.xlu1 %v1196_v5  ;;  %v291_v25 = vshra.s32 %v1201_v10, 16  ;;  %vm404_vm12 = vcmp.eq.f32.partialorder %v1019_v36, %v402_v26 }
 0x1ce   :  { %vm337_vm11 = vcmp.eq.f32.partialorder %v1015_v33, %v335_v22  ;;  %v783_v28 = vsel %vm781_vm13, %v335_v22, %v777_v48  ;;  %v406_v62 = vsel %vm404_vm12, %v967_v7, 32 }
 0x1cf   :  { %v341_v34 = vsel %vm337_vm11, %v1057_v50, 32  ;;  %v789_v35 = vsel %vm787_vm15, %v402_v26, %v783_v28  ;;  %v1221_v37 = vcvt.s32.f32 %v291_v25  ;;  %v1269_v63 = vsel %vm25_vm0, %v406_v62, 2147483647 }
 0x1d0   :  { %v795_v39 = vsel %vm793_vm4, %v1124_v24, %v789_v35  ;;  %v1228_v41 = vsel %vm329_vm3, %v341_v34, 2147483647  ;;  %v424_v47 = vshra.s32 %v1269_v63, 16  ;;  %v277_v26 = vcvt.s32.f32 %v275_v20 }
 0x1d1   :  { %v801_v50 = vsel %vm799_vm9, %v1131_v29, %v795_v39  ;;  %294 = vmin.xlane.f32.xlu0 %v1221_v37  ;;  %478 = vmin.xlane.f32.xlu1 %v1216_v32  ;;  %v359_v45 = vshra.s32 %v1228_v41, 16  ;;  %v167_v29 = vshra.s32 %v1231_v42, 16  ;;  %v1281_v22 = vpop.permute.xlu1 %494  ;;  %v343_v28 = vand.u32 65535, %v1092_v6 }
 0x1d2   :  { %v807_v24 = vsel %vm805_vm10, %v585_v53, %v801_v50  ;;  %v1258_v53 = vcvt.s32.f32 %v607_v56  ;;  %v1275_v8 = vcvt.s32.f32 %v424_v47  ;;  %v461_v35 = vcvt.s32.f32 %v459_v57 }
 0x1d3   :  { %812 = vst.msk [vmem:[%s1625_s5 + $0x8] sm:$0xff] %vm1628_vm14, %v807_v24  ;;  %v1248_v46 = vcvt.s32.f32 %v359_v45  ;;  %v1256_v61 = vcvt.s32.f32 %v167_v29  ;;  %v345_v38 = vcvt.s32.f32 %v343_v28  ;;  %v151_v39 = vand.u32 65535, %v1103_v12 }
 0x1d4   :  { %v526_v24 = vand.u32 65535, %v1135_v30  ;;  %v219_v47 = vand.u32 65535, %v1180_v59  ;;  %v290_v20 = vand.u32 65535, %v1201_v10  ;;  %v358_v10 = vand.u32 65535, %v1228_v41 }
 0x1d5   :  { %362 = vmin.xlane.f32.xlu0 %v1248_v46  ;;  %545 = vmin.xlane.f32.xlu1 %v1250_v54  ;;  %v153_v50 = vcvt.s32.f32 %v151_v39 }
 0x1d6   :  { %v528_v29 = vcvt.s32.f32 %v526_v24  ;;  %v292_v28 = vcvt.s32.f32 %v290_v20  ;;  %v360_v39 = vcvt.s32.f32 %v358_v10 }
 0x1d9   :  { %170 = vmin.xlane.f32.xlu0 %v1256_v61  ;;  %610 = vmin.xlane.f32.xlu1 %v1258_v53 }
 0x1ea   :  { %559 = vrot.lane.b32.xlu1 %v1019_v36, %s909_s11 }
 0x1ef   :  { %308 = vrot.lane.b32.xlu0 %v1015_v33, %s909_s11 }
 0x20c   :  { %v1273_v3 = vpop.xlane.xlu0 %208 }
 0x20d   :  { %vm210_vm5 = vcmp.eq.f32.partialorder %v1083_v0, %v1273_v3 }
 0x20e   :  { %427 = vmin.xlane.f32.xlu1 %v1275_v8  ;;  %v211_v48 = vsel %vm210_vm5, %v206_v16, inf  ;;  %v221_v16 = vcvt.s32.f32 %v219_v47 }
 0x20f   :  { %212 = vmin.xlane.f32.xlu0 %v211_v48 }
 0x210   :  { %v1283_v25 = vpop.xlane.xlu0 %279 }
 0x211   :  { %vm281_vm11 = vcmp.eq.f32.partialorder %v1096_v9, %v1283_v25  ;;  %v286_v47 = vcvt.f32.s32 %v1283_v25 }
 0x212   :  { %v282_v60 = vsel %vm281_vm11, %v277_v26, inf }
 0x213   :  { %283 = vmin.xlane.f32.xlu0 %v282_v60 }
 0x214   :  { %v1289_v34 = vpop.xlane.xlu1 %463  ;;  %v1291_v0 = vpop.xlane.xlu0 %347 }
 0x215   :  { %vm465_vm14 = vcmp.eq.f32.partialorder %v1109_v15, %v1289_v34  ;;  %vm349_vm12 = vcmp.eq.f32.partialorder %v1107_v14, %v1291_v0  ;;  %v591_v15 = vand.u32 65535, %v1138_v31 }
 0x216   :  { %v466_v6 = vsel %vm465_vm14, %v461_v35, inf  ;;  %v350_v11 = vsel %vm349_vm12, %v345_v38, inf }
 0x217   :  { %467 = vmin.xlane.f32.xlu1 %v466_v6  ;;  %351 = vmin.xlane.f32.xlu0 %v350_v11  ;;  %v593_v62 = vcvt.s32.f32 %v591_v15 }
 0x218   :  { %v1298_v9 = vpop.xlane.xlu0 %155 }
 0x219   :  { %vm157_vm5 = vcmp.eq.f32.partialorder %v1114_v17, %v1298_v9  ;;  %v408_v17 = vand.u32 65535, %v1160_v44 }
 0x21a   :  { %v158_v45 = vsel %vm157_vm5, %v153_v50, inf }
 0x21b   :  { %v410_v48 = vcvt.s32.f32 %v408_v17 }
 0x24e   :  { %v1303_v12 = vpop.xlane.xlu1 %530 }
 0x24f   :  { %vm532_vm11 = vcmp.eq.f32.partialorder %v1153_v40, %v1303_v12  ;;  %v474_v40 = vand.u32 65535, %v1177_v58  ;;  %v541_v58 = vand.u32 65535, %v1204_v13  ;;  %v606_v13 = vand.u32 65535, %v1234_v43 }
 0x250   :  { %v533_v14 = vsel %vm532_vm11, %v528_v29, inf  ;;  %v423_v29 = vand.u32 65535, %v1269_v63 }
 0x251   :  { %534 = vmin.xlane.f32.xlu1 %v533_v14  ;;  %v476_v57 = vcvt.s32.f32 %v474_v40  ;;  %v543_v38 = vcvt.s32.f32 %v541_v58  ;;  %v608_v6 = vcvt.s32.f32 %v606_v13 }
 0x252   :  { %v1308_v56 = vpop.xlane.xlu1 %595 }
 0x253   :  { %vm597_vm14 = vcmp.eq.f32.partialorder %v1173_v55, %v1308_v56 }
 0x254   :  { %v598_v30 = vsel %vm597_vm14, %v593_v62, inf  ;;  %v425_v62 = vcvt.s32.f32 %v423_v29  ;;  %v660_v29 = vld [vmem:[%s1623_s3 + $0x48] sm:$0xff] }
 0x255   :  { %599 = vmin.xlane.f32.xlu1 %v598_v30  ;;  %v287_v30 = vshll.u32 %v286_v47, 16  ;;  %v673_v47 = vld [vmem:[%s1623_s3 + $0xb0] sm:$0xff] }
 0x256   :  { %v1314_v2 = vpop.xlane.xlu1 %412  ;;  %v1316_v31 = vpop.xlane.xlu0 %223 }
 0x257   :  { %vm225_vm12 = vcmp.eq.f32.partialorder %v1194_v4, %v1316_v31  ;;  %vm414_vm5 = vcmp.eq.f32.partialorder %v1196_v5, %v1314_v2 }
 0x258   :  { %v226_v44 = vsel %vm225_vm12, %v221_v16, inf  ;;  %v415_v55 = vsel %vm414_vm5, %v410_v48, inf  ;;  %v470_v16 = vcvt.f32.s32 %v1289_v34  ;;  %v215_v48 = vcvt.f32.s32 %v1273_v3 }
 0x259   :  { %227 = vmin.xlane.f32.xlu0 %v226_v44 }
 0x25a   :  { %v1324_v59 = vpop.xlane.xlu1 %478  ;;  %v1326_v26 = vpop.xlane.xlu0 %294  ;;  %v471_v20 = vshll.u32 %v470_v16, 16  ;;  %v537_v16 = vcvt.f32.s32 %v1303_v12 }
 0x25b   :  { %vm480_vm11 = vcmp.eq.f32.partialorder %v1216_v32, %v1324_v59  ;;  %vm296_vm14 = vcmp.eq.f32.partialorder %v1221_v37, %v1326_v26 }
 0x25c   :  { %v481_v4 = vsel %vm480_vm11, %v476_v57, inf  ;;  %v297_v5 = vsel %vm296_vm14, %v292_v28, inf  ;;  %v354_v57 = vcvt.f32.s32 %v1291_v0  ;;  %v682_v0 = vld [vmem:[%s1623_s3 + $0xf8] sm:$0xff] }
 0x25d   :  { %482 = vmin.xlane.f32.xlu1 %v481_v4  ;;  %298 = vmin.xlane.f32.xlu0 %v297_v5  ;;  %v666_v5 = vld [vmem:[%s1623_s3 + $0x78] sm:$0xff] }
 0x25e   :  { %v1334_v60 = vpop.xlane.xlu1 %545  ;;  %v1336_v35 = vpop.xlane.xlu0 %362  ;;  %v355_v58 = vshll.u32 %v354_v57, 16  ;;  %841 = vmatprep.subr.mxu1 %v682_v0 }
 0x25f   :  { %vm547_vm12 = vcmp.eq.f32.partialorder %v1250_v54, %v1334_v60  ;;  %vm364_vm5 = vcmp.eq.f32.partialorder %v1248_v46, %v1336_v35  ;;  %v166_v54 = vand.u32 65535, %v1231_v42  ;;  %842 = vmatpush3.msra.mxu1 %v666_v5  ;;  %v230_v5 = vcvt.f32.s32 %v1316_v31 }
 0x260   :  { %v548_v32 = vsel %vm547_vm12, %v543_v38, inf  ;;  %v365_v37 = vsel %vm364_vm5, %v360_v39, inf  ;;  %v680_v38 = vld [vmem:[%s1623_s3 + $0xe8] sm:$0xff]  ;;  %v301_v31 = vcvt.f32.s32 %v1326_v26  ;;  %v369_v26 = vcvt.f32.s32 %v1336_v35 }
 0x261   :  { %549 = vmin.xlane.f32.xlu1 %v548_v32  ;;  %366 = vmin.xlane.f32.xlu0 %v365_v37  ;;  %v168_v24 = vcvt.s32.f32 %v166_v54  ;;  %v664_v39 = vld [vmem:[%s1623_s3 + $0x68] sm:$0xff]  ;;  %v679_v32 = vld [vmem:[%s1623_s3 + $0xe0] sm:$0xff]  ;;  %v661_v54 = vld [vmem:[%s1623_s3 + $0x50] sm:$0xff] }
 0x262   :  { %v1343_v41 = vpop.xlane.xlu1 %610  ;;  %v1351_v43 = vpop.xlane.xlu0 %170  ;;  %v663_v37 = vld [vmem:[%s1623_s3 + $0x60] sm:$0xff] }
 0x263   :  { %vm612_vm11 = vcmp.eq.f32.partialorder %v1258_v53, %v1343_v41  ;;  %vm172_vm14 = vcmp.eq.f32.partialorder %v1256_v61, %v1351_v43 }
 0x264   :  { %v613_v11 = vsel %vm612_vm11, %v608_v6, inf  ;;  %v173_v14 = vsel %vm172_vm14, %v168_v24, inf  ;;  %v678_v6 = vld [vmem:[%s1623_s3 + $0xd8] sm:$0xff]  ;;  %v676_v24 = vld [vmem:[%s1623_s3 + $0xc8] sm:$0xff] }
 0x265   :  { %614 = vmin.xlane.f32.xlu1 %v613_v11  ;;  %v677_v11 = vld [vmem:[%s1623_s3 + $0xd0] sm:$0xff] }
 0x266   :  { %v1353_v46 = vpop.permute.xlu1 %559  ;;  %v1356_v50 = vpop.permute.xlu0 %308 }
 0x276   :  { %624 = vrot.lane.b32.xlu1 %v1019_v36, %s911_s1 }
 0x277   :  { %376 = vrot.lane.b32.xlu0 %v1015_v33, %s911_s1 }
 0x296   :  { %159 = vmin.xlane.f32.xlu0 %v158_v45 }
 0x297   :  { %v1360_v53 = vpop.xlane.xlu1 %427 }
 0x298   :  { %v213_v15 = vpop.xlane.xlu0 %212  ;;  %vm429_vm12 = vcmp.eq.f32.partialorder %v1275_v8, %v1360_v53 }
 0x299   :  { %v430_v45 = vsel %vm429_vm12, %v425_v62, inf  ;;  %v214_v8 = vcvt.f32.s32 %v213_v15  ;;  %v675_v15 = vld [vmem:[%s1623_s3 + $0xc0] sm:$0xff]  ;;  %v674_v62 = vld [vmem:[%s1623_s3 + $0xb8] sm:$0xff] }
 0x29a   :  { %416 = vmin.xlane.f32.xlu1 %v415_v55  ;;  %174 = vmin.xlane.f32.xlu0 %v173_v14  ;;  %v216_v55 = vshll.u32 %v215_v48, 16  ;;  %v659_v14 = vld [vmem:[%s1623_s3 + $0x40] sm:$0xff]  ;;  %v654_v48 = vld [vmem:[%s1623_s3 + $0x18] sm:$0xff] }
 0x29c   :  { %v284_v42 = vpop.xlane.xlu0 %283  ;;  %v1379_v34 = vadd.s32 %v216_v55, %v214_v8  ;;  %v669_v8 = vld [vmem:[%s1623_s3 + $0x90] sm:$0xff]  ;;  %v602_v55 = vcvt.f32.s32 %v1308_v56  ;;  %v667_v56 = vld [vmem:[%s1623_s3 + $0x80] sm:$0xff] }
 0x29d   :  { %v285_v17 = vcvt.f32.s32 %v284_v42  ;;  %v658_v42 = vld [vmem:[%s1623_s3 + $0x38] sm:$0xff] }
 0x29e   :  { %431 = vmin.xlane.f32.xlu0 %v430_v45  ;;  %vm233_vm14 = vcmp.eq.s32.totalorder %v967_v7, %v1379_v34  ;;  %v657_v45 = vld [vmem:[%s1623_s3 + $0x30] sm:$0xff]  ;;  %v603_v0 = vshll.u32 %v602_v55, 16 }
 0x29f   :  { %v1367_v40 = vadd.s32 %v287_v30, %v285_v17  ;;  %v672_v17 = vld [vmem:[%s1623_s3 + $0xa8] sm:$0xff]  ;;  %v671_v30 = vld [vmem:[%s1623_s3 + $0xa0] sm:$0xff] }
 0x2a0   :  { %v468_v61 = vpop.xlane.xlu1 %467  ;;  %v352_v25 = vpop.xlane.xlu0 %351 }
 0x2a1   :  { %v469_v63 = vcvt.f32.s32 %v468_v61  ;;  %vm304_vm5 = vcmp.eq.s32.totalorder %v967_v7, %v1367_v40  ;;  %v353_v3 = vcvt.f32.s32 %v352_v25  ;;  %v656_v61 = vld [vmem:[%s1623_s3 + $0x28] sm:$0xff]  ;;  %v538_v25 = vshll.u32 %v537_v16, 16 }
 0x2a2   :  { %v312_v28 = vsel %vm304_vm5, %v1061_v52, 0.0  ;;  %v243_v52 = vsel %vm233_vm14, %v1055_v49, 0.0  ;;  %v665_v49 = vld [vmem:[%s1623_s3 + $0x70] sm:$0xff] }
 0x2a3   :  { %v1370_v44 = vadd.s32 %v471_v20, %v469_v63  ;;  %v1383_v4 = vadd.s32 %v355_v58, %v353_v3  ;;  %v655_v63 = vld [vmem:[%s1623_s3 + $0x20] sm:$0xff]  ;;  %v670_v20 = vld [vmem:[%s1623_s3 + $0x98] sm:$0xff]  ;;  %v668_v3 = vld [vmem:[%s1623_s3 + $0x88] sm:$0xff] }
 0x2a4   :  { %v652_v58 = vld [vmem:[%s1623_s3 + $0x8] sm:$0xff] }
 0x2a5   :  { %vm488_vm11 = vcmp.eq.s32.totalorder %v967_v7, %v1370_v44  ;;  %vm372_vm12 = vcmp.eq.s32.totalorder %v967_v7, %v1383_v4 }
 0x2a6   :  { %v498_v10 = vsel %vm488_vm11, %v1117_v18, 0.0  ;;  %v681_v18 = vld [vmem:[%s1623_s3 + $0xf0] sm:$0xff]  ;;  %v380_v13 = vsel %vm372_vm12, %v1059_v51, 0.0  ;;  %v662_v51 = vld [vmem:[%s1623_s3 + $0x58] sm:$0xff] }
 0x2a7   :  { %843 = vmatprep.subr.mxu1 %v681_v18 }
 0x2a8   :  { %844 = vmatpush3.msra.mxu1 %v665_v49 }
 0x2a9   :  { %845 = vmatprep.subr.mxu1 %v680_v38 }
 0x2aa   :  { %846 = vmatpush3.msra.mxu1 %v664_v39  ;;  %v651_v39 = vld [vmem:[%s1623_s3] sm:$0xff] }
 0x2ab   :  { %316 = vrot.lane.b32.xlu1 %v312_v28, %s909_s11  ;;  %847 = vmatprep.subr.mxu1 %v679_v32  ;;  %v653_v28 = vld [vmem:[%s1623_s3 + $0x10] sm:$0xff] }
 0x2ac   :  { %848 = vmatpush3.msra.mxu1 %v663_v37  ;;  %v231_v37 = vshll.u32 %v230_v5, 16 }
 0x2ad   :  { %849 = vmatprep.subr.mxu1 %v678_v6 }
 0x2ae   :  { %850 = vmatpush3.msra.mxu1 %v662_v51 }
 0x2af   :  { %502 = vrot.lane.b32.xlu1 %v498_v10, %s911_s1  ;;  %851 = vmatprep.subr.mxu1 %v677_v11 }
 0x2b0   :  { %852 = vmatpush3.msra.mxu1 %v661_v54  ;;  %v302_v54 = vshll.u32 %v301_v31, 16 }
 0x2b1   :  { %853 = vmatprep.subr.mxu1 %v676_v24  ;;  %v552_v24 = vcvt.f32.s32 %v1334_v60  ;;  %v370_v60 = vshll.u32 %v369_v26, 16 }
 0x2b2   :  { %854 = vmatpush3.msra.mxu1 %v660_v29 }
 0x2b3   :  { %855 = vmatprep.subr.mxu1 %v675_v15 }
 0x2b4   :  { %247 = vrot.lane.b32.xlu0 %v243_v52, %s911_s1  ;;  %856 = vmatpush3.msra.mxu1 %v659_v14 }
 0x2b5   :  { %857 = vmatprep.subr.mxu1 %v674_v62 }
 0x2b6   :  { %858 = vmatpush3.msra.mxu1 %v658_v42 }
 0x2b7   :  { %859 = vmatprep.subr.mxu1 %v673_v47  ;;  %v553_v47 = vshll.u32 %v552_v24, 16 }
 0x2b8   :  { %384 = vrot.lane.b32.xlu0 %v380_v13, %s910_s18  ;;  %860 = vmatpush3.msra.mxu1 %v657_v45  ;;  %v485_v13 = vcvt.f32.s32 %v1324_v59 }
 0x2b9   :  { %861 = vmatprep.subr.mxu1 %v672_v17 }
 0x2ba   :  { %862 = vmatpush3.msra.mxu1 %v656_v61  ;;  %v486_v11 = vshll.u32 %v485_v13, 16  ;;  %v617_v61 = vcvt.f32.s32 %v1343_v41  ;;  %v327_v13 = vadd.s32 64, %v1367_v40 }
 0x2bb   :  { %863 = vmatprep.subr.mxu1 %v671_v30 }
 0x2bc   :  { %864 = vmatpush3.msra.mxu1 %v655_v63 }
 0x2bd   :  { %865 = vmatprep.subr.mxu1 %v670_v20 }
 0x2be   :  { %866 = vmatpush3.msra.mxu1 %v654_v48 }
 0x2bf   :  { %867 = vmatprep.subr.mxu1 %v669_v8  ;;  %v618_v8 = vshll.u32 %v617_v61, 16 }
 0x2c0   :  { %868 = vmatpush3.msra.mxu1 %v653_v28  ;;  %v162_v28 = vcvt.f32.s32 %v1298_v9 }
 0x2c1   :  { %869 = vmatprep.subr.mxu1 %v668_v3  ;;  %v419_v3 = vcvt.f32.s32 %v1314_v2 }
 0x2c2   :  { %870 = vmatpush3.msra.mxu1 %v652_v58  ;;  %v177_v58 = vcvt.f32.s32 %v1351_v43 }
 0x2c3   :  { %871 = vmatprep.subr.mxu1 %v667_v56 }
 0x2c4   :  { %872 = vmatpush3.msra.mxu1 %v651_v39  ;;  %v259_v39 = vadd.s32 32, %v1379_v34  ;;  %v513_v34 = vadd.s32 160, %v1370_v44 }
 0x2da   :  { %v535_v12 = vpop.xlane.xlu1 %534 }
 0x2db   :  { %v536_v57 = vcvt.f32.s32 %v535_v12 }
 0x2dd   :  { %v1485_v10 = vadd.s32 %v538_v25, %v536_v57 }
 0x2de   :  { %v600_v52 = vpop.xlane.xlu1 %599 }
 0x2df   :  { %v601_v18 = vcvt.f32.s32 %v600_v52  ;;  %vm555_vm5 = vcmp.eq.s32.totalorder %v967_v7, %v1485_v10  ;;  %v163_v52 = vshll.u32 %v162_v28, 16 }
 0x2e0   :  { %v563_v49 = vsel %vm555_vm5, %v1119_v21, 0.0 }
 0x2e1   :  { %v1494_v38 = vadd.s32 %v603_v0, %v601_v18  ;;  %567 = vrot.lane.b32.xlu1 %v563_v49, %s909_s11  ;;  %v434_v0 = vcvt.f32.s32 %v1360_v53  ;;  %v420_v18 = vshll.u32 %v419_v3, 16  ;;  %v178_v49 = vshll.u32 %v177_v58, 16 }
 0x2e2   :  { %v228_v32 = vpop.xlane.xlu0 %227 }
 0x2e3   :  { %v229_v6 = vcvt.f32.s32 %v228_v32  ;;  %vm620_vm11 = vcmp.eq.s32.totalorder %v967_v7, %v1494_v38 }
 0x2e4   :  { %v628_v21 = vsel %vm620_vm11, %v1121_v23, 0.0 }
 0x2e5   :  { %v1505_v51 = vadd.s32 %v231_v37, %v229_v6  ;;  %632 = vrot.lane.b32.xlu1 %v628_v21, %s910_s18  ;;  %v435_v37 = vshll.u32 %v434_v0, 16  ;;  %v395_v6 = vadd.s32 96, %v1383_v4 }
 0x2e6   :  { %v483_v59 = vpop.xlane.xlu1 %482  ;;  %v299_v29 = vpop.xlane.xlu0 %298 }
 0x2e7   :  { %v484_v15 = vcvt.f32.s32 %v483_v59  ;;  %v300_v14 = vcvt.f32.s32 %v299_v29  ;;  %vm234_vm14 = vcmp.eq.s32.totalorder %v967_v7, %v1505_v51  ;;  %v260_v24 = vadd.s32 32, %v1505_v51 }
 0x2e8   :  { %v244_v62 = vsel %vm234_vm14, %v1189_v1, 0.0 }
 0x2e9   :  { %v1513_v23 = vadd.s32 %v486_v11, %v484_v15  ;;  %v303_v42 = vadd.s32 %v302_v54, %v300_v14  ;;  %249 = vrot.lane.b32.xlu0 %v244_v62, %s911_s1 }
 0x2ea   :  { %v550_v45 = vpop.xlane.xlu1 %549  ;;  %v367_v17 = vpop.xlane.xlu0 %366 }
 0x2eb   :  { %v551_v30 = vcvt.f32.s32 %v550_v45  ;;  %v368_v35 = vcvt.f32.s32 %v367_v17  ;;  %vm489_vm12 = vcmp.eq.s32.totalorder %v967_v7, %v1513_v23  ;;  %vm305_vm5 = vcmp.eq.s32.totalorder %v967_v7, %v303_v42 }
 0x2ec   :  { %v499_v63 = vsel %vm489_vm12, %v1281_v22, 0.0  ;;  %v313_v20 = vsel %vm305_vm5, %v1356_v50, 0.0  ;;  %v328_v59 = vadd.s32 64, %v303_v42 }
 0x2ed   :  { %v1520_v16 = vadd.s32 %v553_v47, %v551_v30  ;;  %v371_v1 = vadd.s32 %v370_v60, %v368_v35  ;;  %504 = vrot.lane.b32.xlu1 %v499_v63, %s911_s1  ;;  %318 = vrot.lane.b32.xlu0 %v313_v20, %s909_s11  ;;  %v578_v47 = vadd.s32 192, %v1485_v10  ;;  %v643_v60 = vadd.s32 224, %v1494_v38 }
 0x2ee   :  { %v615_v48 = vpop.xlane.xlu1 %614  ;;  %v377_v41 = vpop.permute.xlu0 %376  ;;  %v514_v63 = vadd.s32 160, %v1513_v23 }
 0x2ef   :  { %v616_v12 = vcvt.f32.s32 %v615_v48  ;;  %vm373_vm11 = vcmp.eq.s32.totalorder %v967_v7, %v371_v1  ;;  %vm556_vm14 = vcmp.eq.s32.totalorder %v967_v7, %v1520_v16  ;;  %v396_v29 = vadd.s32 96, %v371_v1 }
 0x2f0   :  { %v381_v25 = vsel %vm373_vm11, %v377_v41, 0.0  ;;  %v564_v22 = vsel %vm556_vm14, %v1353_v46, 0.0  ;;  %v579_v48 = vadd.s32 192, %v1520_v16 }
 0x2f1   :  { %v1529_v55 = vadd.s32 %v618_v8, %v616_v12  ;;  %569 = vrot.lane.b32.xlu1 %v564_v22, %s909_s11  ;;  %386 = vrot.lane.b32.xlu0 %v381_v25, %s910_s18 }
 0x2f2   :  { %v625_v50 = vpop.permute.xlu1 %624 }
 0x2f3   :  { %vm621_vm12 = vcmp.eq.s32.totalorder %v967_v7, %v1529_v55  ;;  %v644_v12 = vadd.s32 224, %v1529_v55 }
 0x2f4   :  { %v629_v57 = vsel %vm621_vm12, %v625_v50, 0.0 }
 0x2f5   :  { %634 = vrot.lane.b32.xlu1 %v629_v57, %s910_s18 }
 0x31f   :  { %v160_v56 = vpop.xlane.xlu0 %159 }
 0x320   :  { %v161_v46 = vcvt.f32.s32 %v160_v56 }
 0x322   :  { %v164_v5 = vadd.s32 %v163_v52, %v161_v46 }
 0x323   :  { %v417_v31 = vpop.xlane.xlu1 %416  ;;  %v175_v32 = vpop.xlane.xlu0 %174 }
 0x324   :  { %vm180_vm5 = vcmp.eq.s32.totalorder %v967_v7, %v164_v5  ;;  %v766_v9 = vsel %vm763_vm6, %v164_v5, 0  ;;  %v418_v2 = vcvt.f32.s32 %v417_v31  ;;  %v176_v43 = vcvt.f32.s32 %v175_v32  ;;  %v645_v5 = vld [vmem:[#allocation3] sm:$0xff]  ;;  %v646_v31 = vld [vmem:[#allocation3 + $0x8] sm:$0xff] }
 0x325   :  { %v772_v53 = vsel %vm769_vm7, %v259_v39, %v766_v9  ;;  %v182_v21 = vsel %vm180_vm5, %v995_v19, 0.0 }
 0x326   :  { %v778_v40 = vsel %vm775_vm8, %v327_v13, %v772_v53  ;;  %v421_v11 = vadd.s32 %v420_v18, %v418_v2  ;;  %v179_v54 = vadd.s32 %v178_v49, %v176_v43  ;;  %184 = vst.msk [vmem:[#allocation2] sm:$0xff] %vm25_vm0, %v182_v21 }
 0x327   :  { %v784_v4 = vsel %vm781_vm13, %v395_v6, %v778_v40  ;;  %v317_v26 = vpop.permute.xlu1 %316  ;;  %v432_v15 = vpop.xlane.xlu0 %431 }
 0x328   :  { %vm437_vm11 = vcmp.eq.s32.totalorder %v967_v7, %v421_v11  ;;  %v446_v19 = vadd.s32 128, %v421_v11  ;;  %vm181_vm14 = vcmp.eq.s32.totalorder %v967_v7, %v179_v54  ;;  %v767_v44 = vsel %vm763_vm6, %v179_v54, 0 }
 0x329   :  { %v773_v14 = vsel %vm769_vm7, %v260_v24, %v767_v44  ;;  %v433_v62 = vcvt.f32.s32 %v432_v15  ;;  %v439_v51 = vsel %vm437_vm11, %v1007_v27, 0.0  ;;  %v183_v42 = vsel %vm181_vm14, %v1015_v33, 0.0 }
 0x32a   :  { %v790_v45 = vsel %vm787_vm15, %v446_v19, %v784_v4  ;;  %v779_v17 = vsel %vm775_vm8, %v328_v59, %v773_v14  ;;  %441 = vst.msk [vmem:[#allocation2 + $0x8] sm:$0xff] %vm25_vm0, %v439_v51  ;;  %185 = vst.msk [vmem:[#allocation2 + $0x10] sm:$0xff] %vm25_vm0, %v183_v42  ;;  %vm1629_vm7 = vcmask 64512  }
 0x32b   :  { %v796_v61 = vsel %vm793_vm4, %v513_v34, %v790_v45  ;;  %v785_v27 = vsel %vm781_vm13, %v396_v29, %v779_v17  ;;  %v436_v33 = vadd.s32 %v435_v37, %v433_v62  ;;  %v503_v10 = vpop.permute.xlu1 %502  ;;  %v248_v30 = vpop.permute.xlu0 %247  ;;  %vm1630_vm8 = vmmov %vm1629_vm7 }
 0x32c   :  { %v802_v35 = vsel %vm799_vm9, %v578_v47, %v796_v61  ;;  %508 = vst.msk [vmem:[#allocation2 + $0x8] sm:$0xff] %vm190_vm1, %v503_v10  ;;  %253 = vst.msk [vmem:[#allocation2] sm:$0xff] %vm190_vm1, %v248_v30 }
 0x32d   :  { %v808_v1 = vsel %vm805_vm10, %v643_v60, %v802_v35  ;;  %vm438_vm6 = vcmp.eq.s32.totalorder %v967_v7, %v436_v33  ;;  %v447_v38 = vadd.s32 128, %v436_v33  ;;  %322 = vst.msk [vmem:[#allocation2] sm:$0xff] %vm261_vm2, %v317_v26 }
 0x32e   :  { %813 = vst.msk [vmem:[%s1626_s6] sm:$0xff] %vm1629_vm7, %v808_v1  ;;  %v440_v20 = vsel %vm438_vm6, %v1019_v36, 0.0 }
 0x32f   :  { %v791_v41 = vsel %vm787_vm15, %v447_v38, %v785_v27  ;;  %v385_v8 = vpop.permute.xlu0 %384  ;;  %442 = vst.msk [vmem:[#allocation2 + $0x18] sm:$0xff] %vm25_vm0, %v440_v20 }
 0x330   :  { %v797_v23 = vsel %vm793_vm4, %v514_v63, %v791_v41  ;;  %390 = vst.msk [vmem:[#allocation2] sm:$0xff] %vm329_vm3, %v385_v8 }
 0x331   :  { %v803_v25 = vsel %vm799_vm9, %v579_v48, %v797_v23 }
 0x332   :  { %v809_v36 = vsel %vm805_vm10, %v644_v12, %v803_v25 }
 0x333   :  { %814 = vst.msk [vmem:[%s1626_s6 + $0x8] sm:$0xff] %vm1630_vm8, %v809_v36  ;;  %s912_s6 = smov [#allocation3]  }
 0x334   :  { %s820_s13 = sshll.u32 %s912_s6, 4  ;;  %s821_s13 = int_to_ptr.vmem [resolvable:$true] %s820_s13 }
 0x335   :  { %s886_s14 = scalar_lea.vmem %s821_s13, 256  ;;  %p891_p1 = scmp.lt.s32.totalorder %s821_s13, %s821_s13 }
 0x336   :  { %p887_p0 = scmp.ne.s32.totalorder %s821_s13, %s886_s14  ;;  %p892_p2 = scmp.lt.s32.totalorder %s886_s14, %s886_s14 }
 0x337   :  { %v647_v7 = vld [vmem:[#allocation2] sm:$0xff] }
 0x338   :  { %p893_p3 = por %p892_p2, %p891_p1 }
 0x33a   :  { %p894_p4 = pnand %p893_p3, %p887_p0 }
 0x353   :  { %v568_v16 = vpop.permute.xlu1 %567 }
 0x354   :  { %573 = vst.msk [vmem:[#allocation2 + $0x8] sm:$0xff] %vm261_vm2, %v568_v16 }
 0x357   :  { %v633_v55 = vpop.permute.xlu1 %632 }
 0x358   :  { %638 = vst.msk [vmem:[#allocation2 + $0x8] sm:$0xff] %vm329_vm3, %v633_v55 }
 0x35b   :  { %v250_v22 = vpop.permute.xlu0 %249 }
 0x35c   :  { %254 = vst.msk [vmem:[#allocation2 + $0x10] sm:$0xff] %vm190_vm1, %v250_v22 }
 0x35f   :  { %v648_v50 = vld [vmem:[#allocation2 + $0x8] sm:$0xff]  ;;  %v505_v57 = vpop.permute.xlu1 %504  ;;  %v319_v28 = vpop.permute.xlu0 %318 }
 0x360   :  { %747 = vmatprep.mubr.f32.mxu1 %v648_v50  ;;  %509 = vst.msk [vmem:[#allocation2 + $0x18] sm:$0xff] %vm190_vm1, %v505_v57 }
 0x361   :  { %323 = vst.msk [vmem:[#allocation2 + $0x10] sm:$0xff] %vm261_vm2, %v319_v28  ;;  %748 = vmatmul.mubr.f32.vlgmr.msra.gmra.mxu1 %v647_v7 }
 0x363   :  { %v570_v3 = vpop.permute.xlu1 %569  ;;  %v387_v58 = vpop.permute.xlu0 %386 }
 0x364   :  { %574 = vst.msk [vmem:[#allocation2 + $0x18] sm:$0xff] %vm261_vm2, %v570_v3 }
 0x365   :  { %391 = vst.msk [vmem:[#allocation2 + $0x10] sm:$0xff] %vm329_vm3, %v387_v58 }
 0x367   :  { %v635_v56 = vpop.permute.xlu1 %634 }
 0x368   :  { %639 = vst.msk [vmem:[#allocation2 + $0x18] sm:$0xff] %vm329_vm3, %v635_v56 }
 0x36c   :  { %v649_v46 = vld [vmem:[#allocation2 + $0x10] sm:$0xff] }
 0x36f   :  { %v650_v52 = vld [vmem:[#allocation2 + $0x18] sm:$0xff] }
 0x370   :  { %752 = vmatprep.mubr.f32.mxu1 %v650_v52 }
 0x371   :  { %753 = vmatmul.mubr.f32.gmra.mxu1 %v649_v46 }
 0x421   :  { %v873_v0 = vpop.f32.mrf.mxu1 }
 0x423   :  { %v874_v18 = vpop.f32.mrf.mxu1 }
 0x424   :  { %v875_v49 = vadd.f32 %v874_v18, %v873_v0 }
 0x426   :  { %v758_v39 = vadd.f32 %v875_v49, %v645_v5 }
 0x428   :  { %760 = vst.msk [vmem:[#allocation3] sm:$0xff] %vm25_vm0, %v758_v39 }
 0x431   :  { %v876_v13 = vpop.f32.mrf.mxu1 }
 0x433   :  { %v877_v32 = vpop.f32.mrf.mxu1 }
 0x434   :  { %v878_v9 = vadd.f32 %v877_v32, %v876_v13 }
 0x436   :  { %v759_v2 = vadd.f32 %v878_v9, %v646_v31 }
 0x438   :  { %761 = vst.msk [vmem:[#allocation3 + $0x8] sm:$0xff] %vm25_vm0, %v759_v2 }
 0x439   :  { %897 = shalt.err (!%p894_p4)
}
 0x43a   :  { %s913_s15 = smov 128   ;;  %s914_s16 = smov 8  }
 0x43b   :  { %826 = dma.vmem_to_hbm [thread:$0]  %s821_s13, 256, %s1624_s4, [#allocation4], %s913_s15, %s913_s15, %s914_s16  }
 0x43c   :  { %906 = dma.done.wait [#allocation4], 256  }
 0x43d   :  { %907 = vsyncadd [#allocation4], 4294967040 }
 0x43e   :  { %838 = vsyncpa [#allocation4], 1 }

</bundles_post_ra>
